<compile_context>
chip_gen: v5e
topology: v5e:2x2
jax: 0.10.0
libtpu: 0.0.40
codegen_flags: <defaults>
</compile_context>

<pallas_src>
import functools

import numpy as np
import jax
import jax.numpy as jnp
from jax.experimental import pallas as pl
from jax.experimental.pallas import tpu as pltpu


# ----------------------------------------------------------------------------
# Chip-generation-aware configuration
# ----------------------------------------------------------------------------
def _detect_v7x():
    try:
        kind = jax.devices()[0].device_kind.lower()
        return ("7x" in kind) or ("v7" in kind) or ("tpu7" in kind)
    except Exception:
        return False


_IS_V7X = _detect_v7x()
_VMEM_LIMIT = (48 << 20) if _IS_V7X else (96 << 20)   # 64 MiB/TC on v7x, 128 MiB on v5e/v6e
_GEMM_TILE = 512 if _IS_V7X else 1024


# ----------------------------------------------------------------------------
# Small helpers
# ----------------------------------------------------------------------------
def _round_up(x, m):
    return (x + m - 1) // m * m


def _m_tiling(m, target=None):
    """Pick (tile_m, padded_M): tile_m is a multiple of 16 and divides padded_M."""
    if target is None:
        target = _GEMM_TILE
    mp = _round_up(max(m, 16), 16)
    if mp <= target:
        # Split into 2 grid steps only on v7x (feed both TensorCores); on
        # single-TC v5e/v6e a split just halves the MXU tile.
        if _IS_V7X and mp >= 64 and (mp // 2) % 16 == 0:
            return mp // 2, mp
        return mp, mp
    steps = -(-mp // target)
    tm = _round_up(-(-mp // steps), 16)
    return tm, tm * steps


def _pad_rows(a, mpad):
    if a.shape[0] == mpad:
        return a
    return jnp.pad(a, ((0, mpad - a.shape[0]),) + ((0, 0),) * (a.ndim - 1))


# ----------------------------------------------------------------------------
# Pallas kernels
# ----------------------------------------------------------------------------
def _mm_bias_kernel(x_ref, w_ref, b_ref, o_ref, *, relu):
    # [tm, K](bf16) @ [K, N](bf16) on the MXU, f32 accumulate, +bias (+ReLU).
    y = jnp.dot(x_ref[...], w_ref[...], preferred_element_type=jnp.float32)
    y = y + b_ref[...]
    if relu:
        y = jnp.maximum(y, 0.0)
    o_ref[...] = y.astype(o_ref.dtype)


def _mm_bias_res_kernel(x_ref, w_ref, b_ref, r_ref, o_ref):
    # Bottleneck tail: matmul + bias + residual + ReLU.
    y = jnp.dot(x_ref[...], w_ref[...], preferred_element_type=jnp.float32)
    y = y + b_ref[...] + r_ref[...].astype(jnp.float32)
    o_ref[...] = jnp.maximum(y, 0.0).astype(o_ref.dtype)


def _conv3x3_flat_kernel(x_ref, w_ref, b_ref, o_ref, patch_ref, *, wi, tm, cin, relu):
    # Direct 3x3 / stride-1 / pad-1 conv: im2col in VMEM (never in HBM).
    #   x_ref     : [1, L, Cin]     whole padded+flattened image (VMEM resident)
    #   w_ref     : [9*Cin, Cout]   taps regrouped along K at build time
    #   b_ref     : [1, Cout]
    #   o_ref     : [1, tm, Cout]
    #   patch_ref : VMEM (tm, 9*Cin) bf16 scratch
    # One MXU dot per tile instead of nine f32-accumulated ones; the static
    # sublane shift is applied to the bf16 input before the matmul.
    m = pl.program_id(1)
    for t in range(9):
        off = (t // 3) * wi + (t % 3)      # static flat-row offset of this tap
        a_off = (off // 16) * 16           # 16-aligned (bf16 sublane packing)
        sh = off - a_off
        start = pl.multiple_of(m * tm + a_off, 16)
        xs = x_ref[0, pl.ds(start, tm + 16), :]            # aligned bf16 load
        patch_ref[:, t * cin:(t + 1) * cin] = xs[sh:sh + tm, :]
    y = jnp.dot(patch_ref[...], w_ref[...], preferred_element_type=jnp.float32)
    y = y + b_ref[...]
    if relu:
        y = jnp.maximum(y, 0.0)
    o_ref[0] = y.astype(o_ref.dtype)


def _maxpool_kernel(*refs):
    # refs[0:9] = the 9 taps of a 3x3 window ([tm, C] each), refs[9] = output.
    o_ref = refs[-1]
    m = refs[0][...]
    for r in refs[1:-1]:
        m = jnp.maximum(m, r[...])
    o_ref[...] = m


def _mse_kernel(x_ref, y_ref, o_ref, acc_ref):
    # Tiled sum of squared differences.  Per step we only do VALU adds into an
    # (8, C) f32 accumulator; the full cross-lane reduce and the (1,1) store
    # happen once, in the last-step epilogue.
    @pl.when(pl.program_id(0) == 0)
    def _():
        acc_ref[...] = jnp.zeros_like(acc_ref)

    d = x_ref[...].astype(jnp.float32) - y_ref[...].astype(jnp.float32)
    dsq = d * d
    acc_ref[...] += jnp.sum(dsq.reshape(-1, 8, dsq.shape[-1]), axis=0)

    @pl.when(pl.program_id(0) == pl.num_programs(0) - 1)
    def _():
        o_ref[...] = jnp.sum(acc_ref[...]).reshape(1, 1)


# ----------------------------------------------------------------------------
# Pallas wrappers
# ----------------------------------------------------------------------------
def _matmul_bias(x2d, w2d, bias, residual=None, relu=True):
    m, k = x2d.shape
    nc = w2d.shape[1]
    tm, mpad = _m_tiling(m)
    xp = _pad_rows(x2d, mpad)

    in_specs = [
        pl.BlockSpec((tm, k), lambda i: (i, 0)),
        pl.BlockSpec((k, nc), lambda i: (0, 0)),   # weight stays VMEM-resident
        pl.BlockSpec((1, nc), lambda i: (0, 0)),
    ]
    args = [xp, w2d, bias.reshape(1, nc)]
    if residual is not None:
        in_specs.append(pl.BlockSpec((tm, nc), lambda i: (i, 0)))
        args.append(_pad_rows(residual, mpad))
        kernel = _mm_bias_res_kernel
    else:
        kernel = functools.partial(_mm_bias_kernel, relu=relu)

    y = pl.pallas_call(
        kernel,
        grid=(mpad // tm,),
        in_specs=in_specs,
        out_specs=pl.BlockSpec((tm, nc), lambda i: (i, 0)),
        out_shape=jax.ShapeDtypeStruct((mpad, nc), jnp.bfloat16),
        compiler_params=pltpu.CompilerParams(
            dimension_semantics=("parallel",),
            vmem_limit_bytes=_VMEM_LIMIT),
    )(*args)
    return y[:m] if mpad != m else y


def _im2col(x, kh, kw, stride, pad):
    n, h, w, c = x.shape
    xp = jnp.pad(x, ((0, 0), (pad, pad), (pad, pad), (0, 0)))
    ho = (h + 2 * pad - kh) // stride + 1
    wo = (w + 2 * pad - kw) // stride + 1
    cols = []
    for i in range(kh):
        for j in range(kw):
            cols.append(xp[:, i:i + stride * ho:stride, j:j + stride * wo:stride, :])
    patches = jnp.concatenate(cols, axis=-1)  # bf16
    return patches.reshape(n * ho * wo, kh * kw * c), (n, ho, wo)


@functools.partial(jax.jit, static_argnames=("kh", "kw", "stride", "pad", "relu"))
def conv_im2col(x, w2d, bias, *, kh, kw, stride, pad, relu):
    # TODO(synk): only conv1 (7x7 s2) and the three 3x3 s2 convs still use
    # HBM im2col; a space-to-depth variant of the flat-tap kernel would remove
    # the remaining patch amplification (and conv1's K=147 MXU padding).
    x2d, (n, ho, wo) = _im2col(x, kh, kw, stride, pad)
    y = _matmul_bias(x2d, w2d, bias, None, relu)
    return y.reshape(n, ho, wo, w2d.shape[1])


@functools.partial(jax.jit, static_argnames=("stride", "relu"))
def conv1x1(x, w2d, bias, residual=None, *, stride=1, relu=True):
    if stride != 1:
        x = x[:, ::stride, ::stride, :]
    n, h, w, cin = x.shape
    cout = w2d.shape[1]
    x2d = x.reshape(n * h * w, cin)
    r2d = None if residual is None else residual.reshape(n * h * w, cout)
    y = _matmul_bias(x2d, w2d, bias, r2d, relu)
    return y.reshape(n, h, w, cout)


@functools.partial(jax.jit, static_argnames=("relu",))
def conv3x3_s1(x, w2d, bias, *, relu=True):
    """3x3 / stride-1 / pad-1 conv with in-VMEM im2col.

    The image is padded (top 1, bottom 2, left 1, right 1) and flattened so
    that, keeping the computed output at the padded width Wi = W + 2, tap
    (i, j) is the contiguous row slice starting at i*Wi + j.  The 2 garbage
    columns per output row are sliced off afterwards.
    """
    n, h, w, cin = x.shape
    cout = w2d.shape[1]
    wi = w + 2
    m = h * wi
    tm, mpad = _m_tiling(m)

    xf = jnp.pad(x, ((0, 0), (1, 2), (1, 1), (0, 0))).reshape(n, (h + 3) * wi, cin)
    need = mpad + 2 * wi + 32          # over-read margin for 16-aligned loads
    if xf.shape[1] < need:
        xf = jnp.pad(xf, ((0, 0), (0, need - xf.shape[1]), (0, 0)))
    flat_len = xf.shape[1]

    kernel = functools.partial(_conv3x3_flat_kernel, wi=wi, tm=tm, cin=cin, relu=relu)
    y = pl.pallas_call(
        kernel,
        grid=(n, mpad // tm),
        in_specs=[
            pl.BlockSpec((1, flat_len, cin), lambda b, i: (b, 0, 0)),
            pl.BlockSpec((9 * cin, cout), lambda b, i: (0, 0)),
            pl.BlockSpec((1, cout), lambda b, i: (0, 0)),
        ],
        out_specs=pl.BlockSpec((1, tm, cout), lambda b, i: (b, i, 0)),
        out_shape=jax.ShapeDtypeStruct((n, mpad, cout), jnp.bfloat16),
        scratch_shapes=[pltpu.VMEM((tm, 9 * cin), jnp.bfloat16)],
        compiler_params=pltpu.CompilerParams(
            dimension_semantics=("parallel", "parallel"),
            vmem_limit_bytes=_VMEM_LIMIT),
    )(xf, w2d, bias.reshape(1, cout))
    return y[:, :m].reshape(n, h, wi, cout)[:, :, :w, :]


@jax.jit
def maxpool3x3s2(x):
    # TODO(synk): the 9 wrapper-level strided taps materialize ~2.25x the input
    # in HBM; an in-kernel windowed max over padded flat rows would remove it.
    # Maxpool runs once on a 64-channel map, so this stage is a small fraction
    # of total HBM traffic.
    n, h, w, c = x.shape
    neg = float(jnp.finfo(x.dtype).min)
    xp = jnp.pad(x, ((0, 0), (1, 1), (1, 1), (0, 0)), constant_values=neg)
    ho = (h + 2 - 3) // 2 + 1
    wo = (w + 2 - 3) // 2 + 1
    m = n * ho * wo
    taps = [xp[:, i:i + 2 * ho:2, j:j + 2 * wo:2, :].reshape(m, c)
            for i in range(3) for j in range(3)]
    tm, mpad = _m_tiling(m)
    taps = [_pad_rows(t, mpad) for t in taps]
    out = pl.pallas_call(
        _maxpool_kernel,
        grid=(mpad // tm,),
        in_specs=[pl.BlockSpec((tm, c), lambda i: (i, 0))] * 9,
        out_specs=pl.BlockSpec((tm, c), lambda i: (i, 0)),
        out_shape=jax.ShapeDtypeStruct((mpad, c), x.dtype),
        compiler_params=pltpu.CompilerParams(
            dimension_semantics=("parallel",),
            vmem_limit_bytes=_VMEM_LIMIT),
    )(*taps)
    return out[:m].reshape(n, ho, wo, c)


@jax.jit
def mse_loss(x, y):
    c = x.shape[-1]
    xf = x.reshape(-1, c)
    yf = y.reshape(-1, c)
    m = xf.shape[0]
    tm, mpad = _m_tiling(m, target=1024)
    xf = _pad_rows(xf, mpad)
    yf = _pad_rows(yf, mpad)
    s = pl.pallas_call(
        _mse_kernel,
        grid=(mpad // tm,),
        in_specs=[pl.BlockSpec((tm, c), lambda i: (i, 0)),
                  pl.BlockSpec((tm, c), lambda i: (i, 0))],
        out_specs=pl.BlockSpec((1, 1), lambda i: (0, 0)),
        out_shape=jax.ShapeDtypeStruct((1, 1), jnp.float32),
        scratch_shapes=[pltpu.VMEM((8, c), jnp.float32)],
        compiler_params=pltpu.CompilerParams(
            dimension_semantics=("arbitrary",),
            vmem_limit_bytes=_VMEM_LIMIT),
    )(xf, yf)
    return s[0, 0] / x.size


# ----------------------------------------------------------------------------
# Deterministic synthetic ResNet101 params (eval-BN folded: scale -> weights)
# ----------------------------------------------------------------------------
class _ParamGen:
    def __init__(self, seed=0):
        self.rng = np.random.default_rng(seed)

    def conv_bn(self, kh, kw, cin, cout, gamma_scale=1.0):
        fan_in = kh * kw * cin
        std = np.sqrt(2.0 / fan_in)
        w = self.rng.standard_normal((kh, kw, cin, cout)).astype(np.float32) * std
        eps = 1e-5
        gamma = (gamma_scale * (1.0 + 0.1 * self.rng.standard_normal(cout))).astype(np.float32)
        beta = (0.1 * self.rng.standard_normal(cout)).astype(np.float32)
        mean = (0.1 * self.rng.standard_normal(cout)).astype(np.float32)
        var = (1.0 + 0.1 * np.abs(self.rng.standard_normal(cout))).astype(np.float32)
        scale = gamma / np.sqrt(var + eps)
        bias = beta - mean * scale
        w_folded = (w * scale[None, None, None, :]).astype(np.float32)
        return w_folded, bias.astype(np.float32)


def build_resnet101(seed=0):
    # TODO(synk): pretrained torchvision weights cannot be loaded; He-init stand-ins.
    g = _ParamGen(seed)
    w, b = g.conv_bn(7, 7, 3, 64)
    params = {
        "conv1_w": jnp.asarray(w.reshape(7 * 7 * 3, 64), jnp.bfloat16),
        "conv1_b": jnp.asarray(b),
    }
    layers_cfg = [(64, 3, 1), (128, 4, 2), (256, 23, 2), (512, 3, 2)]  # ResNet101
    inplanes = 64
    layers = []
    for planes, blocks, stride in layers_cfg:
        blist = []
        for bidx in range(blocks):
            s = stride if bidx == 0 else 1
            w1, b1 = g.conv_bn(1, 1, inplanes, planes)
            w2, b2 = g.conv_bn(3, 3, planes, planes)
            w3, b3 = g.conv_bn(1, 1, planes, planes * 4, gamma_scale=0.25)
            blk = {
                "stride": s,
                "w1": jnp.asarray(w1.reshape(inplanes, planes), jnp.bfloat16),
                "b1": jnp.asarray(b1),
                # (i, j, cin) -> rows of a [9*Cin, Cout] matrix; same grouping
                # used by both the in-VMEM (stride 1) and HBM (stride 2) im2col.
                "w2": jnp.asarray(w2.reshape(9 * planes, planes), jnp.bfloat16),
                "b2": jnp.asarray(b2),
                "w3": jnp.asarray(w3.reshape(planes, planes * 4), jnp.bfloat16),
                "b3": jnp.asarray(b3),
            }
            if s != 1 or inplanes != planes * 4:
                wd, bd = g.conv_bn(1, 1, inplanes, planes * 4, gamma_scale=0.25)
                blk["wd"] = jnp.asarray(wd.reshape(inplanes, planes * 4), jnp.bfloat16)
                blk["bd"] = jnp.asarray(bd)
            blist.append(blk)
            inplanes = planes * 4
        layers.append(blist)
    params["layers"] = layers
    return params


# ----------------------------------------------------------------------------
# Forward pass (ResNet101 trunk = children()[:-2]), then MSE between features
# ----------------------------------------------------------------------------
def _bottleneck(x, blk):
    s = blk["stride"]
    out = conv1x1(x, blk["w1"], blk["b1"], relu=True)
    if s == 1:
        out = conv3x3_s1(out, blk["w2"], blk["b2"], relu=True)
    else:
        out = conv_im2col(out, blk["w2"], blk["b2"],
                          kh=3, kw=3, stride=s, pad=1, relu=True)
    if "wd" in blk:
        identity = conv1x1(x, blk["wd"], blk["bd"], stride=s, relu=False)
    else:
        identity = x
    return conv1x1(out, blk["w3"], blk["b3"], residual=identity, relu=True)


def resnet_features(x_nchw, params):
    x = jnp.transpose(x_nchw, (0, 2, 3, 1)).astype(jnp.bfloat16)  # NCHW -> NHWC
    x = conv_im2col(x, params["conv1_w"], params["conv1_b"],
                    kh=7, kw=7, stride=2, pad=3, relu=True)
    x = maxpool3x3s2(x)
    for blist in params["layers"]:
        for blk in blist:
            x = _bottleneck(x, blk)
    return x  # [N, H/32, W/32, 2048] bf16


def resnet_perceptual_loss(inp_nchw, tgt_nchw, params):
    # Input and target share one pass through the trunk: halves pallas_call
    # launches and doubles M per GEMM tile (the small-shape regime is launch
    # bound).
    n = inp_nchw.shape[0]
    both = jnp.concatenate([inp_nchw, tgt_nchw], axis=0)
    feats = resnet_features(both, params)
    return mse_loss(feats[:n], feats[n:])


if __name__ == "__main__":
    key = jax.random.PRNGKey(0)
    k1, k2 = jax.random.split(key)
    inp = jax.random.normal(k1, (2, 3, 32, 32), dtype=jnp.float32)
    tgt = jax.random.normal(k2, (2, 3, 32, 32), dtype=jnp.float32)

    params = build_resnet101(seed=0)
    loss = resnet_perceptual_loss(inp, tgt, params)
    loss = jax.block_until_ready(loss)
    assert loss.shape == () and bool(jnp.isfinite(loss))
    print("KERNEL_OK")
</pallas_src>

<mosaic_0001>
module attributes {stable_mosaic.version = 11 : i64} {
  func.func @_mm_bias_kernel(%arg0: i32, %arg1: memref<1024x147xbf16, #tpu.memory_space<vmem>>, %arg2: memref<147x64xbf16, #tpu.memory_space<vmem>>, %arg3: memref<1x64xf32, #tpu.memory_space<vmem>>, %arg4: memref<1024x64xbf16, #tpu.memory_space<vmem>>) attributes {dimension_semantics = [#tpu.dimension_semantics<parallel>], iteration_bounds = array<i64: 1>, scalar_prefetch = 0 : i64, scratch_operands = 0 : i64, tpu.core_type = #tpu.core_type<tc>, window_params = [{transform_indices = @transform_0, window_bounds = array<i64: 1024, 147>}, {pipeline_mode = #tpu.pipeline_mode<synchronous>, transform_indices = @transform_1, window_bounds = array<i64: 147, 64>}, {pipeline_mode = #tpu.pipeline_mode<synchronous>, transform_indices = @transform_2, window_bounds = array<i64: 1, 64>}, {transform_indices = @transform_3, window_bounds = array<i64: 1024, 64>}]} {
    %c0 = arith.constant 0 : index
    %c0_0 = arith.constant 0 : index
    %0 = vector.load %arg1[%c0, %c0_0] : memref<1024x147xbf16, #tpu.memory_space<vmem>>, vector<1024x147xbf16>
    %c0_1 = arith.constant 0 : index
    %c0_2 = arith.constant 0 : index
    %1 = vector.load %arg2[%c0_1, %c0_2] : memref<147x64xbf16, #tpu.memory_space<vmem>>, vector<147x64xbf16>
    %cst = arith.constant dense<0.000000e+00> : vector<1024x64xf32>
    %2 = tpu.matmul %0, %1, %cst {dimension_numbers = #tpu.dot_dimension_numbers<[1], [0], [0], [1], [0, 0, 1, 1], [], []>} : vector<1024x147xbf16>, vector<147x64xbf16>, vector<1024x64xf32> -> vector<1024x64xf32>
    %c0_3 = arith.constant 0 : index
    %c0_4 = arith.constant 0 : index
    %3 = vector.load %arg3[%c0_3, %c0_4] : memref<1x64xf32, #tpu.memory_space<vmem>>, vector<1x64xf32>
    %4 = vector.broadcast %3 : vector<1x64xf32> to vector<1024x64xf32>
    %5 = arith.addf %2, %4 : vector<1024x64xf32>
    %cst_5 = arith.constant 0.000000e+00 : f32
    %6 = vector.broadcast %cst_5 : f32 to vector<1024x64xf32>
    %7 = arith.maximumf %5, %6 : vector<1024x64xf32>
    %8 = arith.truncf %7 : vector<1024x64xf32> to vector<1024x64xbf16>
    %c0_6 = arith.constant 0 : index
    %c0_7 = arith.constant 0 : index
    %9 = vector.load %arg4[%c0_6, %c0_7] : memref<1024x64xbf16, #tpu.memory_space<vmem>>, vector<1024x64xbf16>
    tpu.vector_store %arg4[%c0_6, %c0_7], %8 {strides = array<i32>} : memref<1024x64xbf16, #tpu.memory_space<vmem>>, vector<1024x64xbf16>,
    return
  }
  func.func @transform_0(%arg0: i32) -> (i32, i32) {
    %c0_i32 = arith.constant 0 : i32
    %c0_i32_0 = arith.constant 0 : i32
    return %arg0, %c0_i32 : i32, i32
  }
  func.func @transform_1(%arg0: i32) -> (i32, i32) {
    %c0_i32 = arith.constant 0 : i32
    %c0_i32_0 = arith.constant 0 : i32
    %c0_i32_1 = arith.constant 0 : i32
    return %c0_i32, %c0_i32_0 : i32, i32
  }
  func.func @transform_2(%arg0: i32) -> (i32, i32) {
    %c0_i32 = arith.constant 0 : i32
    %c0_i32_0 = arith.constant 0 : i32
    %c0_i32_1 = arith.constant 0 : i32
    return %c0_i32, %c0_i32_0 : i32, i32
  }
  func.func @transform_3(%arg0: i32) -> (i32, i32) {
    %c0_i32 = arith.constant 0 : i32
    %c0_i32_0 = arith.constant 0 : i32
    return %arg0, %c0_i32 : i32, i32
  }
}

</mosaic_0001>

<bundles_post_ra>
// kernel: conv_im2col.1
= control target key start
LH: loop header
LB: loop body
LE: loop exit
PB: predicated region body
PF: predicated region fallthrough
CT: control target
= control target key end

     0   :  { %vm993_vm0 = vcmask 1040384   ;;  %vm994_vm1 = vcmask 1041408   ;;  %v2853_v4 = vmov 65535   ;;  %s4160_s0 = inlined_call_operand.vmem [shape: bf16[1024,147], index: 0, kind: input, shape index: {}]   ;;  %s4161_s1 = inlined_call_operand.vmem [shape: bf16[147,64], index: 1, kind: input, shape index: {}]   ;;  %s4162_s2 = inlined_call_operand.vmem [shape: f32[1,64], index: 2, kind: input, shape index: {}]   ;;  %s4163_s3 = inlined_call_operand.hbm [shape: bf16[1024,64], index: 3, kind: output, shape index: {}]  }
   0x1   :  { %v2808_v0 = vld [vmem:[%s4161_s1 + $0x38] sm:$0xff]  ;;  %v162_v1 = vld [vmem:[%s4161_s1 + $0x48] sm:$0x3]  ;;  %v2807_v3 = vld [vmem:[%s4161_s1 + $0x30] sm:$0xff]  ;;  %v995_v5 = vsel %vm993_vm0, 4294967295, %v2853_v4 }
   0x2   :  { %v780_v2 = vunpack.c.l.b16 %v162_v1  ;;  %1000 = vmatpush.bf16.msra.mxu0 %v2808_v0  ;;  %2810 = vmatpush.bf16.msra.mxu2 %v2808_v0  ;;  %v996_v7 = vsel %vm994_vm1, %v995_v5, 0  ;;  %v2806_v9 = vld [vmem:[%s4161_s1 + $0x28] sm:$0xff]  ;;  %v2809_v10 = vld [vmem:[%s4161_s1 + $0x40] sm:$0xff] }
   0x3   :  { %v2673_v11 = vld [vmem:[%s4160_s0 + $0x4] sm:$0xf]  ;;  %v2065_v12 = vld [vmem:[%s4160_s0 + $0x8] sm:$0xf0] }
   0x4   :  { %v790_v6 = vpack.c.b16 %v780_v2, %v780_v2 }
   0x6   :  { %v998_v8 = vand.u32 %v996_v7, %v790_v6  ;;  %1001 = vmatpush.bf16.msra.mxu0 %v2807_v3  ;;  %2811 = vmatpush.bf16.msra.mxu2 %v2807_v3 }
   0x8   :  { %1335 = vmatpush.bf16.msra.mxu1 %v998_v8  ;;  %2818 = vmatpush.bf16.msra.mxu3 %v998_v8 }
   0x9   :  { %8 = vsyncpa [#allocation3], 0  ;;  %v2739_v13 = vld [vmem:[%s4160_s0 + $0x214] sm:$0xf]  ;;  %v2329_v14 = vld [vmem:[%s4160_s0 + $0x218] sm:$0xf0]  ;;  %v2068_v15 = vor.u32 %v2673_v11, %v2065_v12 }
   0xa   :  { %1002 = vmatpush.bf16.msra.mxu0 %v2806_v9  ;;  %2812 = vmatpush.bf16.msra.mxu2 %v2806_v9  ;;  %v2805_v16 = vld [vmem:[%s4161_s1 + $0x20] sm:$0xff]  ;;  %vm800_vm2 = vcmask 154624   ;;  %v2332_v17 = vor.u32 %v2739_v13, %v2329_v14  ;;  %v2804_v18 = vld [vmem:[%s4161_s1 + $0x18] sm:$0xff]  ;;  %v2803_v19 = vld [vmem:[%s4161_s1 + $0x10] sm:$0xff]  ;;  %vm1914_vm3 = vcmask 519168   ;;  %s2049_s21 = sshll.u32 %s4163_s3, 4  ;;  %s2050_s21 = int_to_ptr.hbm [resolvable:$true] %s2049_s21 }
   0xb   :  { %v2802_v20 = vld [vmem:[%s4161_s1 + $0x8] sm:$0xff]  ;;  %v2675_v21 = vld [vmem:[%s4160_s0 + $0x14] sm:$0xf]  ;;  %v2073_v22 = vld [vmem:[%s4160_s0 + $0x18] sm:$0xf0]  ;;  %s2855_s22 = smov 64  }
   0xc   :  { %1336 = vmatpush.bf16.msra.mxu1 %v2809_v10  ;;  %2819 = vmatpush.bf16.msra.mxu3 %v2809_v10  ;;  %v2741_v23 = vld [vmem:[%s4160_s0 + $0x224] sm:$0xf]  ;;  %v2337_v24 = vld [vmem:[%s4160_s0 + $0x228] sm:$0xf0]  ;;  %v2076_v25 = vor.u32 %v2675_v21, %v2073_v22  ;;  %v2063_v27 = vld [vmem:[%s4160_s0] sm:$0xf] }
   0xd   :  { %v2801_v26 = vld [vmem:[%s4161_s1] sm:$0xff]  ;;  %v2674_v28 = vld [vmem:[%s4160_s0 + $0x4] sm:$0xf0]  ;;  %v2340_v31 = vor.u32 %v2741_v23, %v2337_v24  ;;  %v2081_v35 = vld [vmem:[%s4160_s0 + $0x28] sm:$0xf0]  ;;  %s2856_s23 = smov 4  }
   0xe   :  { %1003 = vmatpush.bf16.msra.mxu0 %v2805_v16  ;;  %2813 = vmatpush.bf16.msra.mxu2 %v2805_v16  ;;  %v2319_v29 = vld [vmem:[%s4160_s0 + $0x200] sm:$0xf]  ;;  %v2738_v30 = vld [vmem:[%s4160_s0 + $0x204] sm:$0xf0]  ;;  %v2064_v32 = vor.u32 %v2674_v28, %v2063_v27  ;;  %v2677_v34 = vld [vmem:[%s4160_s0 + $0x24] sm:$0xf] }
   0xf   :  { %2609 = vmatmul.msk.bf16.vlgmr.msra.gmra.mxu1 %vm800_vm2, %v2068_v15  ;;  %2642 = vmatmul.msk.bf16.vlgmr.msra.gmra.mxu3 %vm800_vm2, %v2332_v17  ;;  %v2320_v33 = vor.u32 %v2738_v30, %v2319_v29  ;;  %v2743_v36 = vld [vmem:[%s4160_s0 + $0x234] sm:$0xf]  ;;  %v2345_v37 = vld [vmem:[%s4160_s0 + $0x238] sm:$0xf0]  ;;  %v2084_v38 = vor.u32 %v2677_v34, %v2081_v35  ;;  %v2071_v39 = vld [vmem:[%s4160_s0 + $0x10] sm:$0xf] }
  0x10   :  { %v2676_v40 = vld [vmem:[%s4160_s0 + $0x14] sm:$0xf0]  ;;  %v2327_v41 = vld [vmem:[%s4160_s0 + $0x210] sm:$0xf]  ;;  %v2348_v43 = vor.u32 %v2743_v36, %v2345_v37  ;;  %v2679_v46 = vld [vmem:[%s4160_s0 + $0x34] sm:$0xf] }
  0x11   :  { %v2740_v42 = vld [vmem:[%s4160_s0 + $0x214] sm:$0xf0]  ;;  %v2072_v44 = vor.u32 %v2676_v40, %v2071_v39  ;;  %v2089_v47 = vld [vmem:[%s4160_s0 + $0x38] sm:$0xf0]  ;;  %v2745_v48 = vld [vmem:[%s4160_s0 + $0x244] sm:$0xf] }
  0x12   :  { %1004 = vmatpush.bf16.msra.mxu0 %v2804_v18  ;;  %2814 = vmatpush.bf16.msra.mxu2 %v2804_v18  ;;  %v2328_v45 = vor.u32 %v2740_v42, %v2327_v41  ;;  %v2353_v49 = vld [vmem:[%s4160_s0 + $0x248] sm:$0xf0]  ;;  %v2092_v50 = vor.u32 %v2679_v46, %v2089_v47  ;;  %v2079_v51 = vld [vmem:[%s4160_s0 + $0x20] sm:$0xf]  ;;  %v2678_v52 = vld [vmem:[%s4160_s0 + $0x24] sm:$0xf0] }
  0x13   :  { %v2335_v53 = vld [vmem:[%s4160_s0 + $0x220] sm:$0xf]  ;;  %v2742_v54 = vld [vmem:[%s4160_s0 + $0x224] sm:$0xf0]  ;;  %v2356_v55 = vor.u32 %v2745_v48, %v2353_v49  ;;  %v2080_v56 = vor.u32 %v2678_v52, %v2079_v51  ;;  %v2681_v58 = vld [vmem:[%s4160_s0 + $0x44] sm:$0xf] }
  0x14   :  { %v2336_v57 = vor.u32 %v2742_v54, %v2335_v53  ;;  %v2097_v59 = vld [vmem:[%s4160_s0 + $0x48] sm:$0xf0]  ;;  %v2747_v60 = vld [vmem:[%s4160_s0 + $0x254] sm:$0xf]  ;;  %v2361_v61 = vld [vmem:[%s4160_s0 + $0x258] sm:$0xf0] }
  0x15   :  { %v2100_v62 = vor.u32 %v2681_v58, %v2097_v59  ;;  %v2087_v63 = vld [vmem:[%s4160_s0 + $0x30] sm:$0xf]  ;;  %v2680_v0 = vld [vmem:[%s4160_s0 + $0x34] sm:$0xf0]  ;;  %v2364_v3 = vor.u32 %v2747_v60, %v2361_v61  ;;  %v2683_v6 = vld [vmem:[%s4160_s0 + $0x54] sm:$0xf] }
  0x16   :  { %1005 = vmatpush.bf16.msra.mxu0 %v2803_v19  ;;  %2815 = vmatpush.bf16.msra.mxu2 %v2803_v19  ;;  %v2343_v1 = vld [vmem:[%s4160_s0 + $0x230] sm:$0xf]  ;;  %v2744_v2 = vld [vmem:[%s4160_s0 + $0x234] sm:$0xf0]  ;;  %v2088_v4 = vor.u32 %v2680_v0, %v2087_v63  ;;  %v2105_v7 = vld [vmem:[%s4160_s0 + $0x58] sm:$0xf0] }
  0x17   :  { %v2344_v5 = vor.u32 %v2744_v2, %v2343_v1  ;;  %v2749_v8 = vld [vmem:[%s4160_s0 + $0x264] sm:$0xf]  ;;  %v2369_v9 = vld [vmem:[%s4160_s0 + $0x268] sm:$0xf0]  ;;  %v2108_v10 = vor.u32 %v2683_v6, %v2105_v7  ;;  %v2095_v11 = vld [vmem:[%s4160_s0 + $0x40] sm:$0xf] }
  0x18   :  { %v2682_v12 = vld [vmem:[%s4160_s0 + $0x44] sm:$0xf0]  ;;  %v2351_v13 = vld [vmem:[%s4160_s0 + $0x240] sm:$0xf]  ;;  %v2372_v15 = vor.u32 %v2749_v8, %v2369_v9  ;;  %v2685_v18 = vld [vmem:[%s4160_s0 + $0x64] sm:$0xf] }
  0x19   :  { %v2746_v14 = vld [vmem:[%s4160_s0 + $0x244] sm:$0xf0]  ;;  %v2096_v16 = vor.u32 %v2682_v12, %v2095_v11  ;;  %v2113_v19 = vld [vmem:[%s4160_s0 + $0x68] sm:$0xf0]  ;;  %v2377_v21 = vld [vmem:[%s4160_s0 + $0x278] sm:$0xf0] }
  0x1a   :  { %1006 = vmatpush.bf16.msra.mxu0 %v2802_v20  ;;  %2816 = vmatpush.bf16.msra.mxu2 %v2802_v20  ;;  %v2352_v17 = vor.u32 %v2746_v14, %v2351_v13  ;;  %v2751_v20 = vld [vmem:[%s4160_s0 + $0x274] sm:$0xf]  ;;  %v2116_v22 = vor.u32 %v2685_v18, %v2113_v19  ;;  %v2103_v23 = vld [vmem:[%s4160_s0 + $0x50] sm:$0xf]  ;;  %v2684_v24 = vld [vmem:[%s4160_s0 + $0x54] sm:$0xf0] }
  0x1b   :  { %v2380_v27 = vor.u32 %v2751_v20, %v2377_v21  ;;  %v2104_v28 = vor.u32 %v2684_v24, %v2103_v23  ;;  %v2687_v30 = vld [vmem:[%s4160_s0 + $0x74] sm:$0xf]  ;;  %v2111_v35 = vld [vmem:[%s4160_s0 + $0x60] sm:$0xf]  ;;  %v2686_v36 = vld [vmem:[%s4160_s0 + $0x64] sm:$0xf0] }
  0x1c   :  { %v2367_v37 = vld [vmem:[%s4160_s0 + $0x260] sm:$0xf]  ;;  %v2112_v40 = vor.u32 %v2686_v36, %v2111_v35  ;;  %v2689_v42 = vld [vmem:[%s4160_s0 + $0x84] sm:$0xf]  ;;  %v2119_v47 = vld [vmem:[%s4160_s0 + $0x70] sm:$0xf] }
  0x1d   :  { %v2688_v48 = vld [vmem:[%s4160_s0 + $0x74] sm:$0xf0]  ;;  %v2137_v58 = vld [vmem:[%s4160_s0 + $0x98] sm:$0xf0]  ;;  %v2757_v59 = vld [vmem:[%s4160_s0 + $0x2a4] sm:$0xf] }
  0x1e   :  { %1007 = vmatpush.bf16.msra.mxu0 %v2801_v26  ;;  %2817 = vmatpush.bf16.msra.mxu2 %v2801_v26  ;;  %v2748_v26 = vld [vmem:[%s4160_s0 + $0x254] sm:$0xf0]  ;;  %v2120_v53 = vor.u32 %v2688_v48, %v2119_v47  ;;  %v2401_v60 = vld [vmem:[%s4160_s0 + $0x2a8] sm:$0xf0]  ;;  %v2690_v63 = vld [vmem:[%s4160_s0 + $0x84] sm:$0xf0] }
  0x1f   :  { %2610 = vmatmul.msk.bf16.gmra.mxu1 %vm800_vm2, %v2076_v25  ;;  %2643 = vmatmul.msk.bf16.gmra.mxu3 %vm800_vm2, %v2340_v31  ;;  %v2359_v25 = vld [vmem:[%s4160_s0 + $0x250] sm:$0xf]  ;;  %v2121_v31 = vld [vmem:[%s4160_s0 + $0x78] sm:$0xf0]  ;;  %v2752_v51 = vld [vmem:[%s4160_s0 + $0x274] sm:$0xf0] }
  0x20   :  { %v2360_v29 = vor.u32 %v2748_v26, %v2359_v25  ;;  %v2124_v34 = vor.u32 %v2687_v30, %v2121_v31  ;;  %v3154_v2 = vld [vmem:[%s4162_s2] ss:$0 sm:$0xff]  ;;  %v2693_v18 = vld [vmem:[%s4160_s0 + $0xa4] sm:$0xf]  ;;  %v2145_v19 = vld [vmem:[%s4160_s0 + $0xa8] sm:$0xf0] }
  0x21   :  { %1008 = vmatmul.bf16.vlgmr.msra.gmra.mxu0 %v2064_v32  ;;  %1168 = vmatmul.bf16.vlgmr.msra.gmra.mxu2 %v2320_v33  ;;  %v2753_v32 = vld [vmem:[%s4160_s0 + $0x284] sm:$0xf]  ;;  %v2385_v33 = vld [vmem:[%s4160_s0 + $0x288] sm:$0xf0]  ;;  %v2759_v21 = vld [vmem:[%s4160_s0 + $0x2b4] sm:$0xf]  ;;  %v2148_v23 = vor.u32 %v2693_v18, %v2145_v19 }
  0x22   :  { %v2388_v39 = vor.u32 %v2753_v32, %v2385_v33  ;;  %v2135_v24 = vld [vmem:[%s4160_s0 + $0x90] sm:$0xf]  ;;  %v2692_v25 = vld [vmem:[%s4160_s0 + $0x94] sm:$0xf0]  ;;  %v2695_v47 = vld [vmem:[%s4160_s0 + $0xb4] sm:$0xf] }
  0x23   :  { %v2756_v30 = vld [vmem:[%s4160_s0 + $0x294] sm:$0xf0]  ;;  %v2153_v48 = vld [vmem:[%s4160_s0 + $0xb8] sm:$0xf0] }
  0x2f   :  { %2611 = vmatmul.msk.bf16.gmra.mxu1 %vm800_vm2, %v2084_v38  ;;  %2644 = vmatmul.msk.bf16.gmra.mxu3 %vm800_vm2, %v2348_v43  ;;  %v2750_v38 = vld [vmem:[%s4160_s0 + $0x264] sm:$0xf0]  ;;  %v2129_v43 = vld [vmem:[%s4160_s0 + $0x88] sm:$0xf0] }
  0x30   :  { %v2368_v41 = vor.u32 %v2750_v38, %v2367_v37  ;;  %v2132_v46 = vor.u32 %v2689_v42, %v2129_v43 }
  0x31   :  { %1013 = vmatmul.bf16.gmra.mxu0 %v2072_v44  ;;  %1173 = vmatmul.bf16.gmra.mxu2 %v2328_v45  ;;  %v2755_v44 = vld [vmem:[%s4160_s0 + $0x294] sm:$0xf]  ;;  %v2393_v45 = vld [vmem:[%s4160_s0 + $0x298] sm:$0xf0] }
  0x32   :  { %v2396_v52 = vor.u32 %v2755_v44, %v2393_v45 }
  0x3f   :  { %2612 = vmatmul.msk.bf16.gmra.mxu1 %vm800_vm2, %v2092_v50  ;;  %2645 = vmatmul.msk.bf16.gmra.mxu3 %vm800_vm2, %v2356_v55  ;;  %v2375_v50 = vld [vmem:[%s4160_s0 + $0x270] sm:$0xf] }
  0x40   :  { %v2376_v54 = vor.u32 %v2752_v51, %v2375_v50  ;;  %v2761_v51 = vld [vmem:[%s4160_s0 + $0x2c4] sm:$0xf] }
  0x41   :  { %1018 = vmatmul.bf16.gmra.mxu0 %v2080_v56  ;;  %1178 = vmatmul.bf16.gmra.mxu2 %v2336_v57  ;;  %v2691_v57 = vld [vmem:[%s4160_s0 + $0x94] sm:$0xf] }
  0x42   :  { %v2140_v61 = vor.u32 %v2691_v57, %v2137_v58  ;;  %v2694_v57 = vld [vmem:[%s4160_s0 + $0xa4] sm:$0xf0] }
  0x4f   :  { %2613 = vmatmul.msk.bf16.gmra.mxu1 %vm800_vm2, %v2100_v62  ;;  %2646 = vmatmul.msk.bf16.gmra.mxu3 %vm800_vm2, %v2364_v3  ;;  %v2127_v62 = vld [vmem:[%s4160_s0 + $0x80] sm:$0xf] }
  0x50   :  { %v2383_v3 = vld [vmem:[%s4160_s0 + $0x280] sm:$0xf]  ;;  %v2128_v6 = vor.u32 %v2690_v63, %v2127_v62 }
  0x51   :  { %1023 = vmatmul.bf16.gmra.mxu0 %v2088_v4  ;;  %1183 = vmatmul.bf16.gmra.mxu2 %v2344_v5  ;;  %v2754_v4 = vld [vmem:[%s4160_s0 + $0x284] sm:$0xf0]  ;;  %v2404_v5 = vor.u32 %v2757_v59, %v2401_v60  ;;  %v2399_v60 = vld [vmem:[%s4160_s0 + $0x2a0] sm:$0xf] }
  0x52   :  { %v2384_v8 = vor.u32 %v2754_v4, %v2383_v3 }
  0x5f   :  { %2614 = vmatmul.msk.bf16.gmra.mxu1 %vm800_vm2, %v2108_v10  ;;  %2647 = vmatmul.msk.bf16.gmra.mxu3 %vm800_vm2, %v2372_v15 }
  0x61   :  { %1028 = vmatmul.bf16.gmra.mxu0 %v2096_v16  ;;  %1188 = vmatmul.bf16.gmra.mxu2 %v2352_v17 }
  0x6f   :  { %2615 = vmatmul.msk.bf16.gmra.mxu1 %vm800_vm2, %v2116_v22  ;;  %2648 = vmatmul.msk.bf16.gmra.mxu3 %vm800_vm2, %v2380_v27  ;;  %v2409_v22 = vld [vmem:[%s4160_s0 + $0x2b8] sm:$0xf0] }
  0x70   :  { %v2412_v31 = vor.u32 %v2759_v21, %v2409_v22  ;;  %v2697_v22 = vld [vmem:[%s4160_s0 + $0xc4] sm:$0xf] }
  0x71   :  { %1033 = vmatmul.bf16.gmra.mxu0 %v2104_v28  ;;  %1193 = vmatmul.bf16.gmra.mxu2 %v2360_v29  ;;  %v2391_v29 = vld [vmem:[%s4160_s0 + $0x290] sm:$0xf] }
  0x72   :  { %v2392_v36 = vor.u32 %v2756_v30, %v2391_v29 }
  0x7f   :  { %2616 = vmatmul.msk.bf16.gmra.mxu1 %vm800_vm2, %v2124_v34  ;;  %2649 = vmatmul.msk.bf16.gmra.mxu3 %vm800_vm2, %v2388_v39  ;;  %v2136_v34 = vor.u32 %v2692_v25, %v2135_v24 }
  0x81   :  { %1038 = vmatmul.bf16.gmra.mxu0 %v2112_v40  ;;  %1198 = vmatmul.bf16.gmra.mxu2 %v2368_v41 }
  0x8c   :  { %v1338_v49 = vpop.f32.mrf.mxu1 }
  0x8f   :  { %2617 = vmatmul.msk.bf16.gmra.mxu1 %vm800_vm2, %v2132_v46  ;;  %2650 = vmatmul.msk.bf16.gmra.mxu3 %vm800_vm2, %v2396_v52  ;;  %v2417_v52 = vld [vmem:[%s4160_s0 + $0x2c8] sm:$0xf0] }
  0x90   :  { %v2420_v62 = vor.u32 %v2761_v51, %v2417_v52 }
  0x91   :  { %1043 = vmatmul.bf16.gmra.mxu0 %v2120_v53  ;;  %1203 = vmatmul.bf16.gmra.mxu2 %v2376_v54  ;;  %v2156_v54 = vor.u32 %v2695_v47, %v2153_v48 }
  0x92   :  { %v3129_v55 = vpop.f32.mrf.mxu3 }
  0x94   :  { %v1340_v56 = vpop.f32.mrf.mxu1 }
  0x9a   :  { %v3149_v0 = vpop.f32.mrf.mxu3 }
  0x9c   :  { %v1343_v1 = vpop.f32.mrf.mxu1 }
  0x9e   :  { %v1009_v7 = vpop.f32.mrf.mxu0 }
  0x9f   :  { %2618 = vmatmul.msk.bf16.gmra.mxu1 %vm800_vm2, %v2140_v61  ;;  %v1010_v9 = vadd.f32 %v3154_v2, %v1009_v7  ;;  %2651 = vmatmul.msk.bf16.gmra.mxu3 %vm800_vm2, %v2404_v5  ;;  %v2758_v61 = vld [vmem:[%s4160_s0 + $0x2a4] sm:$0xf0] }
  0xa0   :  { %v2400_v7 = vor.u32 %v2758_v61, %v2399_v60  ;;  %v2169_v61 = vld [vmem:[%s4160_s0 + $0xd8] sm:$0xf0] }
  0xa1   :  { %v1339_v10 = vadd.f32 %v1338_v49, %v1010_v9  ;;  %1048 = vmatmul.bf16.gmra.mxu0 %v2128_v6  ;;  %1208 = vmatmul.bf16.gmra.mxu2 %v2384_v8 }
  0xa2   :  { %v3165_v11 = vpop.f32.mrf.mxu3 }
  0xa3   :  { %v1658_v12 = vmax.f32 %v1339_v10, 0.0 }
  0xa4   :  { %v1345_v13 = vpop.f32.mrf.mxu1  ;;  %v3167_v15 = vpop.f32.mrf.mxu2 }
  0xa5   :  { %v1786_v14 = vpack.c.bf16 %v1658_v12, %v1658_v12 }
  0xa6   :  { %v1011_v16 = vpop.f32.mrf.mxu0 }
  0xa7   :  { %1915 = vst.msk [vmem:[#allocation2] sm:$0xf] %vm1914_vm3, %v1786_v14  ;;  %v1012_v17 = vadd.f32 %v3154_v2, %v1011_v16 }
  0xa9   :  { %v1341_v20 = vadd.f32 %v1340_v56, %v1012_v17  ;;  %v2143_v56 = vld [vmem:[%s4160_s0 + $0xa0] sm:$0xf] }
  0xaa   :  { %v3189_v26 = vpop.f32.mrf.mxu3  ;;  %v2144_v4 = vor.u32 %v2694_v57, %v2143_v56 }
  0xab   :  { %v1659_v27 = vmax.f32 %v1341_v20, 0.0 }
  0xac   :  { %v1348_v28 = vpop.f32.mrf.mxu1  ;;  %v3197_v33 = vpop.f32.mrf.mxu2 }
  0xad   :  { %v1787_v32 = vpack.c.bf16 %v1659_v27, %v1659_v27  ;;  %v2763_v27 = vld [vmem:[%s4160_s0 + $0x2d4] sm:$0xf] }
  0xae   :  { %v1014_v35 = vpop.f32.mrf.mxu0 }
  0xaf   :  { %2619 = vmatmul.msk.bf16.gmra.mxu1 %vm800_vm2, %v2148_v23  ;;  %1916 = vst.msk [vmem:[#allocation2 + $0x4] sm:$0xf] %vm1914_vm3, %v1787_v32  ;;  %v1015_v37 = vadd.f32 %v3154_v2, %v1014_v35  ;;  %2652 = vmatmul.msk.bf16.gmra.mxu3 %vm800_vm2, %v2412_v31  ;;  %v2161_v23 = vld [vmem:[%s4160_s0 + $0xc8] sm:$0xf0]  ;;  %v2151_v31 = vld [vmem:[%s4160_s0 + $0xb0] sm:$0xf] }
  0xb0   :  { %v2164_v30 = vor.u32 %v2697_v22, %v2161_v23  ;;  %v2696_v32 = vld [vmem:[%s4160_s0 + $0xb4] sm:$0xf0] }
  0xb1   :  { %v1344_v38 = vadd.f32 %v1343_v1, %v1015_v37  ;;  %1053 = vmatmul.bf16.gmra.mxu0 %v2136_v34  ;;  %1213 = vmatmul.bf16.gmra.mxu2 %v2392_v36  ;;  %v2407_v36 = vld [vmem:[%s4160_s0 + $0x2b0] sm:$0xf]  ;;  %v2760_v37 = vld [vmem:[%s4160_s0 + $0x2b4] sm:$0xf0] }
  0xb2   :  { %v3203_v39 = vpop.f32.mrf.mxu3 }
  0xb3   :  { %v1660_v40 = vmax.f32 %v1344_v38, 0.0 }
  0xb4   :  { %v1350_v41 = vpop.f32.mrf.mxu1  ;;  %v1174_v43 = vpop.f32.mrf.mxu2 }
  0xb5   :  { %v1788_v42 = vpack.c.bf16 %v1660_v40, %v1660_v40  ;;  %v1175_v44 = vadd.f32 %v3154_v2, %v1174_v43  ;;  %v2152_v43 = vor.u32 %v2696_v32, %v2151_v31 }
  0xb6   :  { %v1016_v45 = vpop.f32.mrf.mxu0 }
  0xb7   :  { %1917 = vst.msk [vmem:[#allocation2 + $0x8] sm:$0xf] %vm1914_vm3, %v1788_v42  ;;  %v1017_v46 = vadd.f32 %v3154_v2, %v1016_v45  ;;  %v1504_v49 = vadd.f32 %v3129_v55, %v1175_v44 }
  0xb9   :  { %v1346_v50 = vadd.f32 %v1345_v13, %v1017_v46  ;;  %v1724_v53 = vmax.f32 %v1504_v49, 0.0  ;;  %v2408_v46 = vor.u32 %v2760_v37, %v2407_v36  ;;  %v2177_v37 = vld [vmem:[%s4160_s0 + $0xe8] sm:$0xf0] }
  0xba   :  { %v3227_v55 = vpop.f32.mrf.mxu3 }
  0xbb   :  { %v1661_v58 = vmax.f32 %v1346_v50, 0.0  ;;  %v1852_v63 = vpack.c.bf16 %v1724_v53, %v1724_v53 }
  0xbc   :  { %v1353_v59 = vpop.f32.mrf.mxu1  ;;  %v1176_v3 = vpop.f32.mrf.mxu2 }
  0xbd   :  { %v1789_v1 = vpack.c.bf16 %v1661_v58, %v1661_v58  ;;  %1981 = vst.msk [vmem:[#allocation2 + $0x108] sm:$0xf] %vm1914_vm3, %v1852_v63  ;;  %v1177_v5 = vadd.f32 %v3154_v2, %v1176_v3  ;;  %v2433_v3 = vld [vmem:[%s4160_s0 + $0x2e8] sm:$0xf0] }
  0xbe   :  { %v1019_v6 = vpop.f32.mrf.mxu0 }
  0xbf   :  { %2620 = vmatmul.msk.bf16.gmra.mxu1 %vm800_vm2, %v2156_v54  ;;  %1918 = vst.msk [vmem:[#allocation2 + $0xc] sm:$0xf] %vm1914_vm3, %v1789_v1  ;;  %v1020_v8 = vadd.f32 %v3154_v2, %v1019_v6  ;;  %2653 = vmatmul.msk.bf16.gmra.mxu3 %vm800_vm2, %v2420_v62  ;;  %v1506_v9 = vadd.f32 %v3149_v0, %v1177_v5  ;;  %v2765_v1 = vld [vmem:[%s4160_s0 + $0x2e4] sm:$0xf]  ;;  %v2159_v6 = vld [vmem:[%s4160_s0 + $0xc0] sm:$0xf] }
  0xc1   :  { %v1349_v10 = vadd.f32 %v1348_v28, %v1020_v8  ;;  %1058 = vmatmul.bf16.gmra.mxu0 %v2144_v4  ;;  %v1725_v12 = vmax.f32 %v1506_v9, 0.0  ;;  %1218 = vmatmul.bf16.gmra.mxu2 %v2400_v7  ;;  %v2425_v28 = vld [vmem:[%s4160_s0 + $0x2d8] sm:$0xf0]  ;;  %v2698_v7 = vld [vmem:[%s4160_s0 + $0xc4] sm:$0xf0] }
  0xc2   :  { %v3242_v13 = vpop.f32.mrf.mxu3  ;;  %v2428_v38 = vor.u32 %v2763_v27, %v2425_v28 }
  0xc3   :  { %v1662_v14 = vmax.f32 %v1349_v10, 0.0  ;;  %v1853_v17 = vpack.c.bf16 %v1725_v12, %v1725_v12  ;;  %v2415_v10 = vld [vmem:[%s4160_s0 + $0x2c0] sm:$0xf]  ;;  %v2762_v12 = vld [vmem:[%s4160_s0 + $0x2c4] sm:$0xf0] }
  0xc4   :  { %v1355_v16 = vpop.f32.mrf.mxu1  ;;  %v1179_v19 = vpop.f32.mrf.mxu2 }
  0xc5   :  { %v1790_v18 = vpack.c.bf16 %v1662_v14, %v1662_v14  ;;  %1982 = vst.msk [vmem:[#allocation2 + $0x10c] sm:$0xf] %vm1914_vm3, %v1853_v17  ;;  %v1180_v20 = vadd.f32 %v3154_v2, %v1179_v19  ;;  %v2436_v14 = vor.u32 %v2765_v1, %v2433_v3  ;;  %v2160_v19 = vor.u32 %v2698_v7, %v2159_v6 }
  0xc6   :  { %v1021_v21 = vpop.f32.mrf.mxu0 }
  0xc7   :  { %1919 = vst.msk [vmem:[#allocation2 + $0x10] sm:$0xf] %vm1914_vm3, %v1790_v18  ;;  %v1022_v0 = vadd.f32 %v3154_v2, %v1021_v21  ;;  %v1509_v24 = vadd.f32 %v3165_v11, %v1180_v20 }
  0xc9   :  { %v1351_v25 = vadd.f32 %v1350_v41, %v1022_v0  ;;  %v1726_v29 = vmax.f32 %v1509_v24, 0.0  ;;  %v2416_v0 = vor.u32 %v2762_v12, %v2415_v10  ;;  %v2185_v12 = vld [vmem:[%s4160_s0 + $0xf8] sm:$0xf0] }
  0xca   :  { %v3267_v11 = vpop.f32.mrf.mxu3 }
  0xcb   :  { %v1663_v34 = vmax.f32 %v1351_v25, 0.0  ;;  %v1854_v40 = vpack.c.bf16 %v1726_v29, %v1726_v29 }
  0xcc   :  { %v1358_v35 = vpop.f32.mrf.mxu1  ;;  %v1181_v42 = vpop.f32.mrf.mxu2 }
  0xcd   :  { %v1791_v41 = vpack.c.bf16 %v1663_v34, %v1663_v34  ;;  %1983 = vst.msk [vmem:[#allocation2 + $0x110] sm:$0xf] %vm1914_vm3, %v1854_v40  ;;  %v1182_v44 = vadd.f32 %v3154_v2, %v1181_v42  ;;  %v2441_v42 = vld [vmem:[%s4160_s0 + $0x2f8] sm:$0xf0] }
  0xce   :  { %v1024_v45 = vpop.f32.mrf.mxu0 }
  0xcf   :  { %2621 = vmatmul.msk.bf16.gmra.mxu1 %vm800_vm2, %v2164_v30  ;;  %1920 = vst.msk [vmem:[#allocation2 + $0x14] sm:$0xf] %vm1914_vm3, %v1791_v41  ;;  %v1025_v47 = vadd.f32 %v3154_v2, %v1024_v45  ;;  %2654 = vmatmul.msk.bf16.gmra.mxu3 %vm800_vm2, %v2428_v38  ;;  %v1511_v48 = vadd.f32 %v3189_v26, %v1182_v44  ;;  %v2767_v41 = vld [vmem:[%s4160_s0 + $0x2f4] sm:$0xf]  ;;  %v2167_v45 = vld [vmem:[%s4160_s0 + $0xd0] sm:$0xf] }
  0xd1   :  { %v1354_v49 = vadd.f32 %v1353_v59, %v1025_v47  ;;  %1063 = vmatmul.bf16.gmra.mxu0 %v2152_v43  ;;  %v1727_v50 = vmax.f32 %v1511_v48, 0.0  ;;  %1223 = vmatmul.bf16.gmra.mxu2 %v2408_v46  ;;  %v2699_v59 = vld [vmem:[%s4160_s0 + $0xd4] sm:$0xf]  ;;  %v2700_v46 = vld [vmem:[%s4160_s0 + $0xd4] sm:$0xf0] }
  0xd2   :  { %v3282_v51 = vpop.f32.mrf.mxu3  ;;  %v2172_v5 = vor.u32 %v2699_v59, %v2169_v61 }
  0xd3   :  { %v1664_v52 = vmax.f32 %v1354_v49, 0.0  ;;  %v1855_v54 = vpack.c.bf16 %v1727_v50, %v1727_v50  ;;  %v2423_v49 = vld [vmem:[%s4160_s0 + $0x2d0] sm:$0xf]  ;;  %v2764_v50 = vld [vmem:[%s4160_s0 + $0x2d4] sm:$0xf0] }
  0xd4   :  { %v1360_v53 = vpop.f32.mrf.mxu1  ;;  %v1184_v57 = vpop.f32.mrf.mxu2 }
  0xd5   :  { %v1792_v56 = vpack.c.bf16 %v1664_v52, %v1664_v52  ;;  %1984 = vst.msk [vmem:[#allocation2 + $0x114] sm:$0xf] %vm1914_vm3, %v1855_v54  ;;  %v1185_v58 = vadd.f32 %v3154_v2, %v1184_v57  ;;  %v2444_v52 = vor.u32 %v2767_v41, %v2441_v42  ;;  %v2168_v57 = vor.u32 %v2700_v46, %v2167_v45 }
  0xd6   :  { %v1026_v60 = vpop.f32.mrf.mxu0 }
  0xd7   :  { %1921 = vst.msk [vmem:[#allocation2 + $0x18] sm:$0xf] %vm1914_vm3, %v1792_v56  ;;  %v1027_v26 = vadd.f32 %v3154_v2, %v1026_v60  ;;  %v1514_v62 = vadd.f32 %v3203_v39, %v1185_v58 }
  0xd9   :  { %v1356_v63 = vadd.f32 %v1355_v16, %v1027_v26  ;;  %v1728_v4 = vmax.f32 %v1514_v62, 0.0  ;;  %v2424_v26 = vor.u32 %v2764_v50, %v2423_v49  ;;  %v2193_v50 = vld [vmem:[%s4160_s0 + $0x108] sm:$0xf0] }
  0xda   :  { %v3307_v39 = vpop.f32.mrf.mxu3 }
  0xdb   :  { %v1665_v8 = vmax.f32 %v1356_v63, 0.0  ;;  %v1856_v16 = vpack.c.bf16 %v1728_v4, %v1728_v4 }
  0xdc   :  { %v1363_v9 = vpop.f32.mrf.mxu1  ;;  %v1186_v18 = vpop.f32.mrf.mxu2 }
  0xdd   :  { %v1793_v17 = vpack.c.bf16 %v1665_v8, %v1665_v8  ;;  %1985 = vst.msk [vmem:[#allocation2 + $0x118] sm:$0xf] %vm1914_vm3, %v1856_v16  ;;  %v1187_v20 = vadd.f32 %v3154_v2, %v1186_v18  ;;  %v2449_v18 = vld [vmem:[%s4160_s0 + $0x308] sm:$0xf0] }
  0xde   :  { %v1029_v21 = vpop.f32.mrf.mxu0 }
  0xdf   :  { %2622 = vmatmul.msk.bf16.gmra.mxu1 %vm800_vm2, %v2172_v5  ;;  %1922 = vst.msk [vmem:[#allocation2 + $0x1c] sm:$0xf] %vm1914_vm3, %v1793_v17  ;;  %v1030_v22 = vadd.f32 %v3154_v2, %v1029_v21  ;;  %2655 = vmatmul.msk.bf16.gmra.mxu3 %vm800_vm2, %v2436_v14  ;;  %v1516_v23 = vadd.f32 %v3227_v55, %v1187_v20  ;;  %v2769_v17 = vld [vmem:[%s4160_s0 + $0x304] sm:$0xf]  ;;  %v2175_v21 = vld [vmem:[%s4160_s0 + $0xe0] sm:$0xf] }
  0xe1   :  { %v1359_v24 = vadd.f32 %v1358_v35, %v1030_v22  ;;  %1068 = vmatmul.bf16.gmra.mxu0 %v2160_v19  ;;  %v1729_v25 = vmax.f32 %v1516_v23, 0.0  ;;  %1228 = vmatmul.bf16.gmra.mxu2 %v2416_v0  ;;  %v2701_v35 = vld [vmem:[%s4160_s0 + $0xe4] sm:$0xf]  ;;  %v2702_v0 = vld [vmem:[%s4160_s0 + $0xe4] sm:$0xf0] }
  0xe2   :  { %v3322_v27 = vpop.f32.mrf.mxu3  ;;  %v2180_v44 = vor.u32 %v2701_v35, %v2177_v37 }
  0xe3   :  { %v1666_v28 = vmax.f32 %v1359_v24, 0.0  ;;  %v1857_v30 = vpack.c.bf16 %v1729_v25, %v1729_v25  ;;  %v2431_v24 = vld [vmem:[%s4160_s0 + $0x2e0] sm:$0xf]  ;;  %v2766_v25 = vld [vmem:[%s4160_s0 + $0x2e4] sm:$0xf0] }
  0xe4   :  { %v1365_v29 = vpop.f32.mrf.mxu1  ;;  %v1189_v32 = vpop.f32.mrf.mxu2 }
  0xe5   :  { %v1794_v31 = vpack.c.bf16 %v1666_v28, %v1666_v28  ;;  %1986 = vst.msk [vmem:[#allocation2 + $0x11c] sm:$0xf] %vm1914_vm3, %v1857_v30  ;;  %v1190_v34 = vadd.f32 %v3154_v2, %v1189_v32  ;;  %v2452_v28 = vor.u32 %v2769_v17, %v2449_v18  ;;  %v2176_v32 = vor.u32 %v2702_v0, %v2175_v21 }
  0xe6   :  { %v1031_v36 = vpop.f32.mrf.mxu0 }
  0xe7   :  { %1923 = vst.msk [vmem:[#allocation2 + $0x20] sm:$0xf] %vm1914_vm3, %v1794_v31  ;;  %v1032_v55 = vadd.f32 %v3154_v2, %v1031_v36  ;;  %v1519_v38 = vadd.f32 %v3242_v13, %v1190_v34 }
  0xe9   :  { %v1361_v40 = vadd.f32 %v1360_v53, %v1032_v55  ;;  %v1730_v43 = vmax.f32 %v1519_v38, 0.0  ;;  %v2432_v55 = vor.u32 %v2766_v25, %v2431_v24  ;;  %v2201_v25 = vld [vmem:[%s4160_s0 + $0x118] sm:$0xf0] }
  0xea   :  { %v3347_v13 = vpop.f32.mrf.mxu3 }
  0xeb   :  { %v1667_v47 = vmax.f32 %v1361_v40, 0.0  ;;  %v1858_v53 = vpack.c.bf16 %v1730_v43, %v1730_v43 }
  0xec   :  { %v1368_v48 = vpop.f32.mrf.mxu1  ;;  %v1191_v56 = vpop.f32.mrf.mxu2 }
  0xed   :  { %v1795_v54 = vpack.c.bf16 %v1667_v47, %v1667_v47  ;;  %1987 = vst.msk [vmem:[#allocation2 + $0x120] sm:$0xf] %vm1914_vm3, %v1858_v53  ;;  %v1192_v58 = vadd.f32 %v3154_v2, %v1191_v56  ;;  %v2457_v56 = vld [vmem:[%s4160_s0 + $0x318] sm:$0xf0] }
  0xee   :  { %v1034_v60 = vpop.f32.mrf.mxu0 }
  0xef   :  { %2623 = vmatmul.msk.bf16.gmra.mxu1 %vm800_vm2, %v2180_v44  ;;  %1924 = vst.msk [vmem:[#allocation2 + $0x24] sm:$0xf] %vm1914_vm3, %v1795_v54  ;;  %v1035_v59 = vadd.f32 %v3154_v2, %v1034_v60  ;;  %2656 = vmatmul.msk.bf16.gmra.mxu3 %vm800_vm2, %v2444_v52  ;;  %v1521_v61 = vadd.f32 %v3267_v11, %v1192_v58  ;;  %v2771_v54 = vld [vmem:[%s4160_s0 + $0x314] sm:$0xf]  ;;  %v2183_v60 = vld [vmem:[%s4160_s0 + $0xf0] sm:$0xf] }
  0xf1   :  { %v1364_v62 = vadd.f32 %v1363_v9, %v1035_v59  ;;  %1073 = vmatmul.bf16.gmra.mxu0 %v2168_v57  ;;  %v1731_v63 = vmax.f32 %v1521_v61, 0.0  ;;  %1233 = vmatmul.bf16.gmra.mxu2 %v2424_v26  ;;  %v2703_v9 = vld [vmem:[%s4160_s0 + $0xf4] sm:$0xf]  ;;  %v2704_v26 = vld [vmem:[%s4160_s0 + $0xf4] sm:$0xf0] }
  0xf2   :  { %v3362_v1 = vpop.f32.mrf.mxu3  ;;  %v2188_v20 = vor.u32 %v2703_v9, %v2185_v12 }
  0xf3   :  { %v1668_v3 = vmax.f32 %v1364_v62, 0.0  ;;  %v1859_v5 = vpack.c.bf16 %v1731_v63, %v1731_v63  ;;  %v2439_v62 = vld [vmem:[%s4160_s0 + $0x2f0] sm:$0xf]  ;;  %v2768_v63 = vld [vmem:[%s4160_s0 + $0x2f4] sm:$0xf0] }
  0xf4   :  { %v1370_v4 = vpop.f32.mrf.mxu1  ;;  %v1194_v7 = vpop.f32.mrf.mxu2 }
  0xf5   :  { %v1796_v6 = vpack.c.bf16 %v1668_v3, %v1668_v3  ;;  %1988 = vst.msk [vmem:[#allocation2 + $0x124] sm:$0xf] %vm1914_vm3, %v1859_v5  ;;  %v1195_v8 = vadd.f32 %v3154_v2, %v1194_v7  ;;  %v2460_v3 = vor.u32 %v2771_v54, %v2457_v56  ;;  %v2184_v7 = vor.u32 %v2704_v26, %v2183_v60 }
  0xf6   :  { %v1036_v10 = vpop.f32.mrf.mxu0 }
  0xf7   :  { %1925 = vst.msk [vmem:[#allocation2 + $0x28] sm:$0xf] %vm1914_vm3, %v1796_v6  ;;  %v1037_v11 = vadd.f32 %v3154_v2, %v1036_v10  ;;  %v1524_v14 = vadd.f32 %v3282_v51, %v1195_v8 }
  0xf9   :  { %v1366_v16 = vadd.f32 %v1365_v29, %v1037_v11  ;;  %v1732_v19 = vmax.f32 %v1524_v14, 0.0  ;;  %v2440_v11 = vor.u32 %v2768_v63, %v2439_v62  ;;  %v2209_v63 = vld [vmem:[%s4160_s0 + $0x128] sm:$0xf0] }
  0xfa   :  { %v3387_v51 = vpop.f32.mrf.mxu3 }
  0xfb   :  { %v1669_v22 = vmax.f32 %v1366_v16, 0.0  ;;  %v1860_v29 = vpack.c.bf16 %v1732_v19, %v1732_v19 }
  0xfc   :  { %v1373_v23 = vpop.f32.mrf.mxu1  ;;  %v1196_v31 = vpop.f32.mrf.mxu2 }
  0xfd   :  { %v1797_v30 = vpack.c.bf16 %v1669_v22, %v1669_v22  ;;  %1989 = vst.msk [vmem:[#allocation2 + $0x128] sm:$0xf] %vm1914_vm3, %v1860_v29  ;;  %v1197_v34 = vadd.f32 %v3154_v2, %v1196_v31  ;;  %v2465_v31 = vld [vmem:[%s4160_s0 + $0x328] sm:$0xf0] }
  0xfe   :  { %v1039_v36 = vpop.f32.mrf.mxu0 }
  0xff   :  { %2624 = vmatmul.msk.bf16.gmra.mxu1 %vm800_vm2, %v2188_v20  ;;  %1926 = vst.msk [vmem:[#allocation2 + $0x2c] sm:$0xf] %vm1914_vm3, %v1797_v30  ;;  %v1040_v35 = vadd.f32 %v3154_v2, %v1039_v36  ;;  %2657 = vmatmul.msk.bf16.gmra.mxu3 %vm800_vm2, %v2452_v28  ;;  %v1526_v37 = vadd.f32 %v3307_v39, %v1197_v34  ;;  %v2773_v30 = vld [vmem:[%s4160_s0 + $0x324] sm:$0xf]  ;;  %v2191_v36 = vld [vmem:[%s4160_s0 + $0x100] sm:$0xf] }
 0x101   :  { %v1369_v38 = vadd.f32 %v1368_v48, %v1040_v35  ;;  %1078 = vmatmul.bf16.gmra.mxu0 %v2176_v32  ;;  %v1733_v40 = vmax.f32 %v1526_v37, 0.0  ;;  %1238 = vmatmul.bf16.gmra.mxu2 %v2432_v55  ;;  %v2705_v48 = vld [vmem:[%s4160_s0 + $0x104] sm:$0xf]  ;;  %v2706_v55 = vld [vmem:[%s4160_s0 + $0x104] sm:$0xf0] }
 0x102   :  { %v3402_v41 = vpop.f32.mrf.mxu3  ;;  %v2196_v58 = vor.u32 %v2705_v48, %v2193_v50 }
 0x103   :  { %v1670_v42 = vmax.f32 %v1369_v38, 0.0  ;;  %v1861_v44 = vpack.c.bf16 %v1733_v40, %v1733_v40  ;;  %v2447_v38 = vld [vmem:[%s4160_s0 + $0x300] sm:$0xf]  ;;  %v2770_v40 = vld [vmem:[%s4160_s0 + $0x304] sm:$0xf0] }
 0x104   :  { %v1375_v43 = vpop.f32.mrf.mxu1  ;;  %v1199_v46 = vpop.f32.mrf.mxu2 }
 0x105   :  { %v1798_v45 = vpack.c.bf16 %v1670_v42, %v1670_v42  ;;  %1990 = vst.msk [vmem:[#allocation2 + $0x12c] sm:$0xf] %vm1914_vm3, %v1861_v44  ;;  %v1200_v47 = vadd.f32 %v3154_v2, %v1199_v46  ;;  %v2468_v42 = vor.u32 %v2773_v30, %v2465_v31  ;;  %v2192_v46 = vor.u32 %v2706_v55, %v2191_v36 }
 0x106   :  { %v1041_v49 = vpop.f32.mrf.mxu0 }
 0x107   :  { %1927 = vst.msk [vmem:[#allocation2 + $0x30] sm:$0xf] %vm1914_vm3, %v1798_v45  ;;  %v1042_v39 = vadd.f32 %v3154_v2, %v1041_v49  ;;  %v1529_v52 = vadd.f32 %v3322_v27, %v1200_v47 }
 0x109   :  { %v1371_v53 = vadd.f32 %v1370_v4, %v1042_v39  ;;  %v1734_v57 = vmax.f32 %v1529_v52, 0.0  ;;  %v2448_v39 = vor.u32 %v2770_v40, %v2447_v38  ;;  %v2217_v40 = vld [vmem:[%s4160_s0 + $0x138] sm:$0xf0] }
 0x10a   :  { %v3427_v27 = vpop.f32.mrf.mxu3 }
 0x10b   :  { %v1671_v59 = vmax.f32 %v1371_v53, 0.0  ;;  %v1862_v4 = vpack.c.bf16 %v1734_v57, %v1734_v57 }
 0x10c   :  { %v1378_v61 = vpop.f32.mrf.mxu1  ;;  %v1201_v6 = vpop.f32.mrf.mxu2 }
 0x10d   :  { %v1799_v5 = vpack.c.bf16 %v1671_v59, %v1671_v59  ;;  %1991 = vst.msk [vmem:[#allocation2 + $0x130] sm:$0xf] %vm1914_vm3, %v1862_v4  ;;  %v1202_v8 = vadd.f32 %v3154_v2, %v1201_v6  ;;  %v2473_v6 = vld [vmem:[%s4160_s0 + $0x338] sm:$0xf0] }
 0x10e   :  { %v1044_v10 = vpop.f32.mrf.mxu0 }
 0x10f   :  { %2625 = vmatmul.msk.bf16.gmra.mxu1 %vm800_vm2, %v2196_v58  ;;  %1928 = vst.msk [vmem:[#allocation2 + $0x34] sm:$0xf] %vm1914_vm3, %v1799_v5  ;;  %v1045_v9 = vadd.f32 %v3154_v2, %v1044_v10  ;;  %2658 = vmatmul.msk.bf16.gmra.mxu3 %vm800_vm2, %v2460_v3  ;;  %v1531_v12 = vadd.f32 %v3347_v13, %v1202_v8  ;;  %v2775_v5 = vld [vmem:[%s4160_s0 + $0x334] sm:$0xf]  ;;  %v2199_v10 = vld [vmem:[%s4160_s0 + $0x110] sm:$0xf] }
 0x111   :  { %v1374_v14 = vadd.f32 %v1373_v23, %v1045_v9  ;;  %1083 = vmatmul.bf16.gmra.mxu0 %v2184_v7  ;;  %v1735_v16 = vmax.f32 %v1531_v12, 0.0  ;;  %1243 = vmatmul.bf16.gmra.mxu2 %v2440_v11  ;;  %v2707_v23 = vld [vmem:[%s4160_s0 + $0x114] sm:$0xf]  ;;  %v2708_v11 = vld [vmem:[%s4160_s0 + $0x114] sm:$0xf0] }
 0x112   :  { %v3442_v17 = vpop.f32.mrf.mxu3  ;;  %v2204_v34 = vor.u32 %v2707_v23, %v2201_v25 }
 0x113   :  { %v1672_v18 = vmax.f32 %v1374_v14, 0.0  ;;  %v1863_v20 = vpack.c.bf16 %v1735_v16, %v1735_v16  ;;  %v2455_v14 = vld [vmem:[%s4160_s0 + $0x310] sm:$0xf]  ;;  %v2772_v16 = vld [vmem:[%s4160_s0 + $0x314] sm:$0xf0] }
 0x114   :  { %v1380_v19 = vpop.f32.mrf.mxu1  ;;  %v1204_v0 = vpop.f32.mrf.mxu2 }
 0x115   :  { %v1800_v21 = vpack.c.bf16 %v1672_v18, %v1672_v18  ;;  %1992 = vst.msk [vmem:[#allocation2 + $0x134] sm:$0xf] %vm1914_vm3, %v1863_v20  ;;  %v1205_v22 = vadd.f32 %v3154_v2, %v1204_v0  ;;  %v2476_v18 = vor.u32 %v2775_v5, %v2473_v6  ;;  %v2200_v0 = vor.u32 %v2708_v11, %v2199_v10 }
 0x116   :  { %v1046_v24 = vpop.f32.mrf.mxu0 }
 0x117   :  { %1929 = vst.msk [vmem:[#allocation2 + $0x38] sm:$0xf] %vm1914_vm3, %v1800_v21  ;;  %v1047_v13 = vadd.f32 %v3154_v2, %v1046_v24  ;;  %v1534_v28 = vadd.f32 %v3362_v1, %v1205_v22 }
 0x119   :  { %v1376_v29 = vadd.f32 %v1375_v43, %v1047_v13  ;;  %v1736_v32 = vmax.f32 %v1534_v28, 0.0  ;;  %v2456_v13 = vor.u32 %v2772_v16, %v2455_v14  ;;  %v2225_v16 = vld [vmem:[%s4160_s0 + $0x148] sm:$0xf0] }
 0x11a   :  { %v3467_v1 = vpop.f32.mrf.mxu3 }
 0x11b   :  { %v1673_v35 = vmax.f32 %v1376_v29, 0.0  ;;  %v1864_v43 = vpack.c.bf16 %v1736_v32, %v1736_v32 }
 0x11c   :  { %v1383_v37 = vpop.f32.mrf.mxu1  ;;  %v1206_v45 = vpop.f32.mrf.mxu2 }
 0x11d   :  { %v1801_v44 = vpack.c.bf16 %v1673_v35, %v1673_v35  ;;  %1993 = vst.msk [vmem:[#allocation2 + $0x138] sm:$0xf] %vm1914_vm3, %v1864_v43  ;;  %v1207_v47 = vadd.f32 %v3154_v2, %v1206_v45  ;;  %v2481_v45 = vld [vmem:[%s4160_s0 + $0x348] sm:$0xf0] }
 0x11e   :  { %v1049_v49 = vpop.f32.mrf.mxu0 }
 0x11f   :  { %2626 = vmatmul.msk.bf16.gmra.mxu1 %vm800_vm2, %v2204_v34  ;;  %1930 = vst.msk [vmem:[#allocation2 + $0x3c] sm:$0xf] %vm1914_vm3, %v1801_v44  ;;  %v1050_v48 = vadd.f32 %v3154_v2, %v1049_v49  ;;  %2659 = vmatmul.msk.bf16.gmra.mxu3 %vm800_vm2, %v2468_v42  ;;  %v1536_v50 = vadd.f32 %v3387_v51, %v1207_v47  ;;  %v2777_v44 = vld [vmem:[%s4160_s0 + $0x344] sm:$0xf]  ;;  %v2207_v49 = vld [vmem:[%s4160_s0 + $0x120] sm:$0xf] }
 0x121   :  { %v1379_v52 = vadd.f32 %v1378_v61, %v1050_v48  ;;  %1088 = vmatmul.bf16.gmra.mxu0 %v2192_v46  ;;  %v1737_v53 = vmax.f32 %v1536_v50, 0.0  ;;  %1248 = vmatmul.bf16.gmra.mxu2 %v2448_v39  ;;  %v2709_v61 = vld [vmem:[%s4160_s0 + $0x124] sm:$0xf]  ;;  %v2710_v39 = vld [vmem:[%s4160_s0 + $0x124] sm:$0xf0] }
 0x122   :  { %v3482_v54 = vpop.f32.mrf.mxu3  ;;  %v2212_v8 = vor.u32 %v2709_v61, %v2209_v63 }
 0x123   :  { %v1674_v56 = vmax.f32 %v1379_v52, 0.0  ;;  %v1865_v58 = vpack.c.bf16 %v1737_v53, %v1737_v53  ;;  %v2463_v52 = vld [vmem:[%s4160_s0 + $0x320] sm:$0xf]  ;;  %v2774_v53 = vld [vmem:[%s4160_s0 + $0x324] sm:$0xf0] }
 0x124   :  { %v1385_v57 = vpop.f32.mrf.mxu1  ;;  %v1209_v26 = vpop.f32.mrf.mxu2 }
 0x125   :  { %v1802_v60 = vpack.c.bf16 %v1674_v56, %v1674_v56  ;;  %1994 = vst.msk [vmem:[#allocation2 + $0x13c] sm:$0xf] %vm1914_vm3, %v1865_v58  ;;  %v1210_v59 = vadd.f32 %v3154_v2, %v1209_v26  ;;  %v2484_v56 = vor.u32 %v2777_v44, %v2481_v45  ;;  %v2208_v26 = vor.u32 %v2710_v39, %v2207_v49 }
 0x126   :  { %v1051_v62 = vpop.f32.mrf.mxu0 }
 0x127   :  { %1931 = vst.msk [vmem:[#allocation2 + $0x40] sm:$0xf] %vm1914_vm3, %v1802_v60  ;;  %v1052_v51 = vadd.f32 %v3154_v2, %v1051_v62  ;;  %v1539_v3 = vadd.f32 %v3402_v41, %v1210_v59 }
 0x129   :  { %v1381_v4 = vadd.f32 %v1380_v19, %v1052_v51  ;;  %v1738_v7 = vmax.f32 %v1539_v3, 0.0  ;;  %v2464_v51 = vor.u32 %v2774_v53, %v2463_v52  ;;  %v2233_v53 = vld [vmem:[%s4160_s0 + $0x158] sm:$0xf0] }
 0x12a   :  { %v3507_v41 = vpop.f32.mrf.mxu3 }
 0x12b   :  { %v1675_v9 = vmax.f32 %v1381_v4, 0.0  ;;  %v1866_v19 = vpack.c.bf16 %v1738_v7, %v1738_v7 }
 0x12c   :  { %v1388_v12 = vpop.f32.mrf.mxu1  ;;  %v1211_v21 = vpop.f32.mrf.mxu2 }
 0x12d   :  { %v1803_v20 = vpack.c.bf16 %v1675_v9, %v1675_v9  ;;  %1995 = vst.msk [vmem:[#allocation2 + $0x140] sm:$0xf] %vm1914_vm3, %v1866_v19  ;;  %v1212_v22 = vadd.f32 %v3154_v2, %v1211_v21  ;;  %v2489_v21 = vld [vmem:[%s4160_s0 + $0x358] sm:$0xf0] }
 0x12e   :  { %v1054_v24 = vpop.f32.mrf.mxu0 }
 0x12f   :  { %2627 = vmatmul.msk.bf16.gmra.mxu1 %vm800_vm2, %v2212_v8  ;;  %1932 = vst.msk [vmem:[#allocation2 + $0x44] sm:$0xf] %vm1914_vm3, %v1803_v20  ;;  %v1055_v23 = vadd.f32 %v3154_v2, %v1054_v24  ;;  %2660 = vmatmul.msk.bf16.gmra.mxu3 %vm800_vm2, %v2476_v18  ;;  %v1541_v25 = vadd.f32 %v3427_v27, %v1212_v22  ;;  %v2779_v20 = vld [vmem:[%s4160_s0 + $0x354] sm:$0xf]  ;;  %v2215_v24 = vld [vmem:[%s4160_s0 + $0x130] sm:$0xf] }
 0x131   :  { %v1384_v28 = vadd.f32 %v1383_v37, %v1055_v23  ;;  %1093 = vmatmul.bf16.gmra.mxu0 %v2200_v0  ;;  %v1739_v29 = vmax.f32 %v1541_v25, 0.0  ;;  %1253 = vmatmul.bf16.gmra.mxu2 %v2456_v13  ;;  %v2711_v37 = vld [vmem:[%s4160_s0 + $0x134] sm:$0xf]  ;;  %v2712_v13 = vld [vmem:[%s4160_s0 + $0x134] sm:$0xf0] }
 0x132   :  { %v3522_v30 = vpop.f32.mrf.mxu3  ;;  %v2220_v47 = vor.u32 %v2711_v37, %v2217_v40 }
 0x133   :  { %v1676_v31 = vmax.f32 %v1384_v28, 0.0  ;;  %v1867_v34 = vpack.c.bf16 %v1739_v29, %v1739_v29  ;;  %v2471_v28 = vld [vmem:[%s4160_s0 + $0x330] sm:$0xf]  ;;  %v2776_v29 = vld [vmem:[%s4160_s0 + $0x334] sm:$0xf0] }
 0x134   :  { %v1390_v32 = vpop.f32.mrf.mxu1  ;;  %v1214_v55 = vpop.f32.mrf.mxu2 }
 0x135   :  { %v1804_v36 = vpack.c.bf16 %v1676_v31, %v1676_v31  ;;  %1996 = vst.msk [vmem:[#allocation2 + $0x144] sm:$0xf] %vm1914_vm3, %v1867_v34  ;;  %v1215_v35 = vadd.f32 %v3154_v2, %v1214_v55  ;;  %v2492_v31 = vor.u32 %v2779_v20, %v2489_v21  ;;  %v2216_v55 = vor.u32 %v2712_v13, %v2215_v24 }
 0x136   :  { %v1056_v38 = vpop.f32.mrf.mxu0 }
 0x137   :  { %1933 = vst.msk [vmem:[#allocation2 + $0x48] sm:$0xf] %vm1914_vm3, %v1804_v36  ;;  %v1057_v27 = vadd.f32 %v3154_v2, %v1056_v38  ;;  %v1544_v42 = vadd.f32 %v3442_v17, %v1215_v35 }
 0x139   :  { %v1386_v43 = vadd.f32 %v1385_v57, %v1057_v27  ;;  %v1740_v46 = vmax.f32 %v1544_v42, 0.0  ;;  %v2472_v27 = vor.u32 %v2776_v29, %v2471_v28  ;;  %v2241_v29 = vld [vmem:[%s4160_s0 + $0x168] sm:$0xf0] }
 0x13a   :  { %v3547_v17 = vpop.f32.mrf.mxu3 }
 0x13b   :  { %v1677_v48 = vmax.f32 %v1386_v43, 0.0  ;;  %v1868_v57 = vpack.c.bf16 %v1740_v46, %v1740_v46 }
 0x13c   :  { %v1393_v50 = vpop.f32.mrf.mxu1  ;;  %v1216_v60 = vpop.f32.mrf.mxu2 }
 0x13d   :  { %v1805_v58 = vpack.c.bf16 %v1677_v48, %v1677_v48  ;;  %1997 = vst.msk [vmem:[#allocation2 + $0x148] sm:$0xf] %vm1914_vm3, %v1868_v57  ;;  %v1217_v59 = vadd.f32 %v3154_v2, %v1216_v60  ;;  %v2497_v60 = vld [vmem:[%s4160_s0 + $0x368] sm:$0xf0] }
 0x13e   :  { %v1059_v62 = vpop.f32.mrf.mxu0 }
 0x13f   :  { %2628 = vmatmul.msk.bf16.gmra.mxu1 %vm800_vm2, %v2220_v47  ;;  %1934 = vst.msk [vmem:[#allocation2 + $0x4c] sm:$0xf] %vm1914_vm3, %v1805_v58  ;;  %v1060_v61 = vadd.f32 %v3154_v2, %v1059_v62  ;;  %2661 = vmatmul.msk.bf16.gmra.mxu3 %vm800_vm2, %v2484_v56  ;;  %v1546_v63 = vadd.f32 %v3467_v1, %v1217_v59  ;;  %v2781_v58 = vld [vmem:[%s4160_s0 + $0x364] sm:$0xf]  ;;  %v2223_v59 = vld [vmem:[%s4160_s0 + $0x140] sm:$0xf] }
 0x140   :  { %v2714_v62 = vld [vmem:[%s4160_s0 + $0x144] sm:$0xf0] }
 0x141   :  { %v1389_v3 = vadd.f32 %v1388_v12, %v1060_v61  ;;  %1098 = vmatmul.bf16.gmra.mxu0 %v2208_v26  ;;  %v1741_v4 = vmax.f32 %v1546_v63, 0.0  ;;  %1258 = vmatmul.bf16.gmra.mxu2 %v2464_v51  ;;  %v2713_v12 = vld [vmem:[%s4160_s0 + $0x144] sm:$0xf]  ;;  %v2479_v63 = vld [vmem:[%s4160_s0 + $0x340] sm:$0xf] }
 0x142   :  { %v3562_v5 = vpop.f32.mrf.mxu3  ;;  %v2228_v22 = vor.u32 %v2713_v12, %v2225_v16 }
 0x143   :  { %v1678_v6 = vmax.f32 %v1389_v3, 0.0  ;;  %v1869_v8 = vpack.c.bf16 %v1741_v4, %v1741_v4  ;;  %v2778_v3 = vld [vmem:[%s4160_s0 + $0x344] sm:$0xf0]  ;;  %v2500_v4 = vor.u32 %v2781_v58, %v2497_v60 }
 0x144   :  { %v1395_v7 = vpop.f32.mrf.mxu1  ;;  %v1219_v11 = vpop.f32.mrf.mxu2 }
 0x145   :  { %v1806_v10 = vpack.c.bf16 %v1678_v6, %v1678_v6  ;;  %1998 = vst.msk [vmem:[#allocation2 + $0x14c] sm:$0xf] %vm1914_vm3, %v1869_v8  ;;  %v1220_v9 = vadd.f32 %v3154_v2, %v1219_v11  ;;  %v3639_v11 = vld [vmem:[%s4162_s2] ss:$0 sm:$0xff] }
 0x146   :  { %v1061_v14 = vpop.f32.mrf.mxu0 }
 0x147   :  { %1935 = vst.msk [vmem:[#allocation2 + $0x50] sm:$0xf] %vm1914_vm3, %v1806_v10  ;;  %v1062_v1 = vadd.f32 %v3154_v2, %v1061_v14  ;;  %v1549_v18 = vadd.f32 %v3482_v54, %v1220_v9  ;;  %v2224_v10 = vor.u32 %v2714_v62, %v2223_v59 }
 0x149   :  { %v1391_v19 = vadd.f32 %v1390_v32, %v1062_v1  ;;  %v1742_v0 = vmax.f32 %v1549_v18, 0.0  ;;  %v2480_v1 = vor.u32 %v2778_v3, %v2479_v63  ;;  %v2249_v3 = vld [vmem:[%s4160_s0 + $0x178] sm:$0xf0] }
 0x14a   :  { %v3587_v54 = vpop.f32.mrf.mxu3 }
 0x14b   :  { %v1679_v23 = vmax.f32 %v1391_v19, 0.0  ;;  %v1870_v32 = vpack.c.bf16 %v1742_v0, %v1742_v0 }
 0x14c   :  { %v1398_v25 = vpop.f32.mrf.mxu1  ;;  %v1221_v36 = vpop.f32.mrf.mxu2 }
 0x14d   :  { %v1807_v34 = vpack.c.bf16 %v1679_v23, %v1679_v23  ;;  %1999 = vst.msk [vmem:[#allocation2 + $0x150] sm:$0xf] %vm1914_vm3, %v1870_v32  ;;  %v1222_v35 = vadd.f32 %v3154_v2, %v1221_v36  ;;  %v2505_v36 = vld [vmem:[%s4160_s0 + $0x378] sm:$0xf0] }
 0x14e   :  { %v1064_v38 = vpop.f32.mrf.mxu0 }
 0x14f   :  { %2629 = vmatmul.msk.bf16.gmra.mxu1 %vm800_vm2, %v2228_v22  ;;  %1936 = vst.msk [vmem:[#allocation2 + $0x54] sm:$0xf] %vm1914_vm3, %v1807_v34  ;;  %v1065_v37 = vadd.f32 %v3154_v2, %v1064_v38  ;;  %2662 = vmatmul.msk.bf16.gmra.mxu3 %vm800_vm2, %v2492_v31  ;;  %v1551_v40 = vadd.f32 %v3507_v41, %v1222_v35  ;;  %v2783_v34 = vld [vmem:[%s4160_s0 + $0x374] sm:$0xf]  ;;  %v2231_v38 = vld [vmem:[%s4160_s0 + $0x150] sm:$0xf] }
 0x151   :  { %v1394_v42 = vadd.f32 %v1393_v50, %v1065_v37  ;;  %1103 = vmatmul.bf16.gmra.mxu0 %v2216_v55  ;;  %v1743_v43 = vmax.f32 %v1551_v40, 0.0  ;;  %1263 = vmatmul.bf16.gmra.mxu2 %v2472_v27  ;;  %v2715_v50 = vld [vmem:[%s4160_s0 + $0x154] sm:$0xf]  ;;  %v2716_v27 = vld [vmem:[%s4160_s0 + $0x154] sm:$0xf0] }
 0x152   :  { %v3602_v44 = vpop.f32.mrf.mxu3  ;;  %v2236_v26 = vor.u32 %v2715_v50, %v2233_v53 }
 0x153   :  { %v1680_v45 = vmax.f32 %v1394_v42, 0.0  ;;  %v1871_v47 = vpack.c.bf16 %v1743_v43, %v1743_v43  ;;  %v2487_v42 = vld [vmem:[%s4160_s0 + $0x350] sm:$0xf]  ;;  %v2780_v43 = vld [vmem:[%s4160_s0 + $0x354] sm:$0xf0] }
 0x154   :  { %v1400_v46 = vpop.f32.mrf.mxu1  ;;  %v1224_v39 = vpop.f32.mrf.mxu2 }
 0x155   :  { %v1808_v49 = vpack.c.bf16 %v1680_v45, %v1680_v45  ;;  %2000 = vst.msk [vmem:[#allocation2 + $0x154] sm:$0xf] %vm1914_vm3, %v1871_v47  ;;  %v1225_v48 = vadd.f32 %v3154_v2, %v1224_v39  ;;  %v2508_v45 = vor.u32 %v2783_v34, %v2505_v36  ;;  %v2232_v39 = vor.u32 %v2716_v27, %v2231_v38 }
 0x156   :  { %v1066_v52 = vpop.f32.mrf.mxu0 }
 0x157   :  { %1937 = vst.msk [vmem:[#allocation2 + $0x58] sm:$0xf] %vm1914_vm3, %v1808_v49  ;;  %v1067_v41 = vadd.f32 %v3154_v2, %v1066_v52  ;;  %v1554_v56 = vadd.f32 %v3522_v30, %v1225_v48 }
 0x159   :  { %v1396_v57 = vadd.f32 %v1395_v7, %v1067_v41  ;;  %v1744_v2 = vmax.f32 %v1554_v56, 0.0  ;;  %v2488_v41 = vor.u32 %v2780_v43, %v2487_v42  ;;  %v2257_v43 = vld [vmem:[%s4160_s0 + $0x188] sm:$0xf0] }
 0x15a   :  { %v3627_v30 = vpop.f32.mrf.mxu3 }
 0x15b   :  { %v1681_v51 = vmax.f32 %v1396_v57, 0.0  ;;  %v1872_v6 = vpack.c.bf16 %v1744_v2, %v1744_v2 }
 0x15c   :  { %v1403_v61 = vpop.f32.mrf.mxu1  ;;  %v1226_v8 = vpop.f32.mrf.mxu2 }
 0x15d   :  { %v1809_v7 = vpack.c.bf16 %v1681_v51, %v1681_v51  ;;  %2001 = vst.msk [vmem:[#allocation2 + $0x158] sm:$0xf] %vm1914_vm3, %v1872_v6  ;;  %v1227_v9 = vadd.f32 %v3639_v11, %v1226_v8  ;;  %v2513_v8 = vld [vmem:[%s4160_s0 + $0x388] sm:$0xf0] }
 0x15e   :  { %v1069_v14 = vpop.f32.mrf.mxu0 }
 0x15f   :  { %2630 = vmatmul.msk.bf16.gmra.mxu1 %vm800_vm2, %v2236_v26  ;;  %1938 = vst.msk [vmem:[#allocation2 + $0x5c] sm:$0xf] %vm1914_vm3, %v1809_v7  ;;  %v1070_v12 = vadd.f32 %v3639_v11, %v1069_v14  ;;  %2663 = vmatmul.msk.bf16.gmra.mxu3 %vm800_vm2, %v2500_v4  ;;  %v1556_v16 = vadd.f32 %v3547_v17, %v1227_v9  ;;  %v2785_v7 = vld [vmem:[%s4160_s0 + $0x384] sm:$0xf]  ;;  %v2239_v14 = vld [vmem:[%s4160_s0 + $0x160] sm:$0xf] }
 0x161   :  { %v1399_v18 = vadd.f32 %v1398_v25, %v1070_v12  ;;  %1108 = vmatmul.bf16.gmra.mxu0 %v2224_v10  ;;  %v1745_v19 = vmax.f32 %v1556_v16, 0.0  ;;  %1268 = vmatmul.bf16.gmra.mxu2 %v2480_v1  ;;  %v2717_v25 = vld [vmem:[%s4160_s0 + $0x164] sm:$0xf]  ;;  %v2718_v1 = vld [vmem:[%s4160_s0 + $0x164] sm:$0xf0] }
 0x162   :  { %v3647_v20 = vpop.f32.mrf.mxu3  ;;  %v2244_v35 = vor.u32 %v2717_v25, %v2241_v29 }
 0x163   :  { %v1682_v21 = vmax.f32 %v1399_v18, 0.0  ;;  %v1873_v22 = vpack.c.bf16 %v1745_v19, %v1745_v19  ;;  %v2495_v18 = vld [vmem:[%s4160_s0 + $0x360] sm:$0xf]  ;;  %v2782_v19 = vld [vmem:[%s4160_s0 + $0x364] sm:$0xf0] }
 0x164   :  { %v1405_v0 = vpop.f32.mrf.mxu1  ;;  %v1229_v13 = vpop.f32.mrf.mxu2 }
 0x165   :  { %v1810_v24 = vpack.c.bf16 %v1682_v21, %v1682_v21  ;;  %2002 = vst.msk [vmem:[#allocation2 + $0x15c] sm:$0xf] %vm1914_vm3, %v1873_v22  ;;  %v1230_v23 = vadd.f32 %v3639_v11, %v1229_v13  ;;  %v2516_v21 = vor.u32 %v2785_v7, %v2513_v8  ;;  %v2240_v13 = vor.u32 %v2718_v1, %v2239_v14 }
 0x166   :  { %v1071_v28 = vpop.f32.mrf.mxu0 }
 0x167   :  { %1939 = vst.msk [vmem:[#allocation2 + $0x60] sm:$0xf] %vm1914_vm3, %v1810_v24  ;;  %v1072_v17 = vadd.f32 %v3639_v11, %v1071_v28  ;;  %v1559_v31 = vadd.f32 %v3562_v5, %v1230_v23 }
 0x169   :  { %v1401_v32 = vadd.f32 %v1400_v46, %v1072_v17  ;;  %v1746_v55 = vmax.f32 %v1559_v31, 0.0  ;;  %v2496_v17 = vor.u32 %v2782_v19, %v2495_v18  ;;  %v2265_v19 = vld [vmem:[%s4160_s0 + $0x198] sm:$0xf0] }
 0x16a   :  { %v3672_v5 = vpop.f32.mrf.mxu3 }
 0x16b   :  { %v1683_v37 = vmax.f32 %v1401_v32, 0.0  ;;  %v1874_v46 = vpack.c.bf16 %v1746_v55, %v1746_v55 }
 0x16c   :  { %v1408_v40 = vpop.f32.mrf.mxu1  ;;  %v1231_v49 = vpop.f32.mrf.mxu2 }
 0x16d   :  { %v1811_v47 = vpack.c.bf16 %v1683_v37, %v1683_v37  ;;  %2003 = vst.msk [vmem:[#allocation2 + $0x160] sm:$0xf] %vm1914_vm3, %v1874_v46  ;;  %v1232_v48 = vadd.f32 %v3639_v11, %v1231_v49  ;;  %v2521_v49 = vld [vmem:[%s4160_s0 + $0x398] sm:$0xf0] }
 0x16e   :  { %v1074_v52 = vpop.f32.mrf.mxu0 }
 0x16f   :  { %2631 = vmatmul.msk.bf16.gmra.mxu1 %vm800_vm2, %v2244_v35  ;;  %1940 = vst.msk [vmem:[#allocation2 + $0x64] sm:$0xf] %vm1914_vm3, %v1811_v47  ;;  %v1075_v50 = vadd.f32 %v3639_v11, %v1074_v52  ;;  %2664 = vmatmul.msk.bf16.gmra.mxu3 %vm800_vm2, %v2508_v45  ;;  %v1561_v53 = vadd.f32 %v3587_v54, %v1232_v48  ;;  %v2787_v47 = vld [vmem:[%s4160_s0 + $0x394] sm:$0xf]  ;;  %v2247_v52 = vld [vmem:[%s4160_s0 + $0x170] sm:$0xf] }
 0x171   :  { %v1404_v56 = vadd.f32 %v1403_v61, %v1075_v50  ;;  %1113 = vmatmul.bf16.gmra.mxu0 %v2232_v39  ;;  %v1747_v57 = vmax.f32 %v1561_v53, 0.0  ;;  %1273 = vmatmul.bf16.gmra.mxu2 %v2488_v41  ;;  %v2719_v61 = vld [vmem:[%s4160_s0 + $0x174] sm:$0xf]  ;;  %v2720_v41 = vld [vmem:[%s4160_s0 + $0x174] sm:$0xf0] }
 0x172   :  { %v3687_v58 = vpop.f32.mrf.mxu3  ;;  %v2252_v9 = vor.u32 %v2719_v61, %v2249_v3 }
 0x173   :  { %v1684_v60 = vmax.f32 %v1404_v56, 0.0  ;;  %v1875_v26 = vpack.c.bf16 %v1747_v57, %v1747_v57  ;;  %v2503_v56 = vld [vmem:[%s4160_s0 + $0x370] sm:$0xf]  ;;  %v2784_v57 = vld [vmem:[%s4160_s0 + $0x374] sm:$0xf0] }
 0x174   :  { %v1410_v2 = vpop.f32.mrf.mxu1  ;;  %v1234_v62 = vpop.f32.mrf.mxu2 }
 0x175   :  { %v1812_v59 = vpack.c.bf16 %v1684_v60, %v1684_v60  ;;  %2004 = vst.msk [vmem:[#allocation2 + $0x164] sm:$0xf] %vm1914_vm3, %v1875_v26  ;;  %v1235_v51 = vadd.f32 %v3639_v11, %v1234_v62  ;;  %v2524_v60 = vor.u32 %v2787_v47, %v2521_v49  ;;  %v2248_v62 = vor.u32 %v2720_v41, %v2247_v52 }
 0x176   :  { %v1076_v63 = vpop.f32.mrf.mxu0 }
 0x177   :  { %1941 = vst.msk [vmem:[#allocation2 + $0x68] sm:$0xf] %vm1914_vm3, %v1812_v59  ;;  %v1077_v54 = vadd.f32 %v3639_v11, %v1076_v63  ;;  %v1564_v4 = vadd.f32 %v3602_v44, %v1235_v51 }
 0x179   :  { %v1406_v6 = vadd.f32 %v1405_v0, %v1077_v54  ;;  %v1748_v10 = vmax.f32 %v1564_v4, 0.0  ;;  %v2504_v54 = vor.u32 %v2784_v57, %v2503_v56  ;;  %v2273_v57 = vld [vmem:[%s4160_s0 + $0x1a8] sm:$0xf0] }
 0x17a   :  { %v3712_v44 = vpop.f32.mrf.mxu3 }
 0x17b   :  { %v1685_v12 = vmax.f32 %v1406_v6, 0.0  ;;  %v1876_v0 = vpack.c.bf16 %v1748_v10, %v1748_v10 }
 0x17c   :  { %v1413_v16 = vpop.f32.mrf.mxu1  ;;  %v1236_v24 = vpop.f32.mrf.mxu2 }
 0x17d   :  { %v1813_v22 = vpack.c.bf16 %v1685_v12, %v1685_v12  ;;  %2005 = vst.msk [vmem:[#allocation2 + $0x168] sm:$0xf] %vm1914_vm3, %v1876_v0  ;;  %v1237_v23 = vadd.f32 %v3639_v11, %v1236_v24  ;;  %v2529_v24 = vld [vmem:[%s4160_s0 + $0x3a8] sm:$0xf0] }
 0x17e   :  { %v1079_v28 = vpop.f32.mrf.mxu0 }
 0x17f   :  { %2632 = vmatmul.msk.bf16.gmra.mxu1 %vm800_vm2, %v2252_v9  ;;  %1942 = vst.msk [vmem:[#allocation2 + $0x6c] sm:$0xf] %vm1914_vm3, %v1813_v22  ;;  %v1080_v25 = vadd.f32 %v3639_v11, %v1079_v28  ;;  %2665 = vmatmul.msk.bf16.gmra.mxu3 %vm800_vm2, %v2516_v21  ;;  %v1566_v29 = vadd.f32 %v3627_v30, %v1237_v23  ;;  %v2789_v22 = vld [vmem:[%s4160_s0 + $0x3a4] sm:$0xf]  ;;  %v2255_v28 = vld [vmem:[%s4160_s0 + $0x180] sm:$0xf] }
 0x181   :  { %v1409_v31 = vadd.f32 %v1408_v40, %v1080_v25  ;;  %1118 = vmatmul.bf16.gmra.mxu0 %v2240_v13  ;;  %v1749_v32 = vmax.f32 %v1566_v29, 0.0  ;;  %1278 = vmatmul.bf16.gmra.mxu2 %v2496_v17  ;;  %v2721_v40 = vld [vmem:[%s4160_s0 + $0x184] sm:$0xf]  ;;  %v2722_v17 = vld [vmem:[%s4160_s0 + $0x184] sm:$0xf0] }
 0x182   :  { %v3727_v34 = vpop.f32.mrf.mxu3  ;;  %v2260_v48 = vor.u32 %v2721_v40, %v2257_v43 }
 0x183   :  { %v1686_v36 = vmax.f32 %v1409_v31, 0.0  ;;  %v1877_v35 = vpack.c.bf16 %v1749_v32, %v1749_v32  ;;  %v2511_v31 = vld [vmem:[%s4160_s0 + $0x380] sm:$0xf]  ;;  %v2786_v32 = vld [vmem:[%s4160_s0 + $0x384] sm:$0xf0] }
 0x184   :  { %v1415_v55 = vpop.f32.mrf.mxu1  ;;  %v1239_v27 = vpop.f32.mrf.mxu2 }
 0x185   :  { %v1814_v38 = vpack.c.bf16 %v1686_v36, %v1686_v36  ;;  %2006 = vst.msk [vmem:[#allocation2 + $0x16c] sm:$0xf] %vm1914_vm3, %v1877_v35  ;;  %v1240_v37 = vadd.f32 %v3639_v11, %v1239_v27  ;;  %v2532_v36 = vor.u32 %v2789_v22, %v2529_v24  ;;  %v2256_v27 = vor.u32 %v2722_v17, %v2255_v28 }
 0x186   :  { %v1081_v42 = vpop.f32.mrf.mxu0 }
 0x187   :  { %1943 = vst.msk [vmem:[#allocation2 + $0x70] sm:$0xf] %vm1914_vm3, %v1814_v38  ;;  %v1082_v30 = vadd.f32 %v3639_v11, %v1081_v42  ;;  %v1569_v45 = vadd.f32 %v3647_v20, %v1240_v37 }
 0x189   :  { %v1411_v46 = vadd.f32 %v1410_v2, %v1082_v30  ;;  %v1750_v39 = vmax.f32 %v1569_v45, 0.0  ;;  %v2512_v30 = vor.u32 %v2786_v32, %v2511_v31  ;;  %v2281_v32 = vld [vmem:[%s4160_s0 + $0x1b8] sm:$0xf0] }
 0x18a   :  { %v3752_v20 = vpop.f32.mrf.mxu3 }
 0x18b   :  { %v1687_v50 = vmax.f32 %v1411_v46, 0.0  ;;  %v1878_v2 = vpack.c.bf16 %v1750_v39, %v1750_v39 }
 0x18c   :  { %v1418_v53 = vpop.f32.mrf.mxu1  ;;  %v1241_v59 = vpop.f32.mrf.mxu2 }
 0x18d   :  { %v1815_v26 = vpack.c.bf16 %v1687_v50, %v1687_v50  ;;  %2007 = vst.msk [vmem:[#allocation2 + $0x170] sm:$0xf] %vm1914_vm3, %v1878_v2  ;;  %v1242_v51 = vadd.f32 %v3639_v11, %v1241_v59  ;;  %v2537_v59 = vld [vmem:[%s4160_s0 + $0x3b8] sm:$0xf0] }
 0x18e   :  { %v1084_v63 = vpop.f32.mrf.mxu0 }
 0x18f   :  { %2633 = vmatmul.msk.bf16.gmra.mxu1 %vm800_vm2, %v2260_v48  ;;  %1944 = vst.msk [vmem:[#allocation2 + $0x74] sm:$0xf] %vm1914_vm3, %v1815_v26  ;;  %v1085_v61 = vadd.f32 %v3639_v11, %v1084_v63  ;;  %2666 = vmatmul.msk.bf16.gmra.mxu3 %vm800_vm2, %v2524_v60  ;;  %v1571_v3 = vadd.f32 %v3672_v5, %v1242_v51  ;;  %v2791_v26 = vld [vmem:[%s4160_s0 + $0x3b4] sm:$0xf]  ;;  %v2263_v63 = vld [vmem:[%s4160_s0 + $0x190] sm:$0xf] }
 0x191   :  { %v1414_v4 = vadd.f32 %v1413_v16, %v1085_v61  ;;  %1123 = vmatmul.bf16.gmra.mxu0 %v2248_v62  ;;  %v1751_v6 = vmax.f32 %v1571_v3, 0.0  ;;  %1283 = vmatmul.bf16.gmra.mxu2 %v2504_v54  ;;  %v2723_v16 = vld [vmem:[%s4160_s0 + $0x194] sm:$0xf]  ;;  %v2724_v54 = vld [vmem:[%s4160_s0 + $0x194] sm:$0xf0] }
 0x192   :  { %v3767_v7 = vpop.f32.mrf.mxu3  ;;  %v2268_v23 = vor.u32 %v2723_v16, %v2265_v19 }
 0x193   :  { %v1688_v8 = vmax.f32 %v1414_v4, 0.0  ;;  %v1879_v9 = vpack.c.bf16 %v1751_v6, %v1751_v6  ;;  %v2519_v4 = vld [vmem:[%s4160_s0 + $0x390] sm:$0xf]  ;;  %v2788_v6 = vld [vmem:[%s4160_s0 + $0x394] sm:$0xf0] }
 0x194   :  { %v1420_v10 = vpop.f32.mrf.mxu1  ;;  %v1244_v1 = vpop.f32.mrf.mxu2 }
 0x195   :  { %v1816_v14 = vpack.c.bf16 %v1688_v8, %v1688_v8  ;;  %2008 = vst.msk [vmem:[#allocation2 + $0x174] sm:$0xf] %vm1914_vm3, %v1879_v9  ;;  %v1245_v12 = vadd.f32 %v3639_v11, %v1244_v1  ;;  %v2540_v8 = vor.u32 %v2791_v26, %v2537_v59  ;;  %v2264_v1 = vor.u32 %v2724_v54, %v2263_v63 }
 0x196   :  { %v1086_v18 = vpop.f32.mrf.mxu0 }
 0x197   :  { %1945 = vst.msk [vmem:[#allocation2 + $0x78] sm:$0xf] %vm1914_vm3, %v1816_v14  ;;  %v1087_v5 = vadd.f32 %v3639_v11, %v1086_v18  ;;  %v1574_v21 = vadd.f32 %v3687_v58, %v1245_v12 }
 0x199   :  { %v1416_v0 = vadd.f32 %v1415_v55, %v1087_v5  ;;  %v1752_v13 = vmax.f32 %v1574_v21, 0.0  ;;  %v2520_v5 = vor.u32 %v2788_v6, %v2519_v4  ;;  %v2289_v6 = vld [vmem:[%s4160_s0 + $0x1c8] sm:$0xf0] }
 0x19a   :  { %v3792_v58 = vpop.f32.mrf.mxu3 }
 0x19b   :  { %v1689_v25 = vmax.f32 %v1416_v0, 0.0  ;;  %v1880_v55 = vpack.c.bf16 %v1752_v13, %v1752_v13 }
 0x19c   :  { %v1423_v29 = vpop.f32.mrf.mxu1  ;;  %v1246_v38 = vpop.f32.mrf.mxu2 }
 0x19d   :  { %v1817_v35 = vpack.c.bf16 %v1689_v25, %v1689_v25  ;;  %2009 = vst.msk [vmem:[#allocation2 + $0x178] sm:$0xf] %vm1914_vm3, %v1880_v55  ;;  %v1247_v37 = vadd.f32 %v3639_v11, %v1246_v38  ;;  %v2545_v38 = vld [vmem:[%s4160_s0 + $0x3c8] sm:$0xf0] }
 0x19e   :  { %v1089_v42 = vpop.f32.mrf.mxu0 }
 0x19f   :  { %2634 = vmatmul.msk.bf16.gmra.mxu1 %vm800_vm2, %v2268_v23  ;;  %1946 = vst.msk [vmem:[#allocation2 + $0x7c] sm:$0xf] %vm1914_vm3, %v1817_v35  ;;  %v1090_v40 = vadd.f32 %v3639_v11, %v1089_v42  ;;  %2667 = vmatmul.msk.bf16.gmra.mxu3 %vm800_vm2, %v2532_v36  ;;  %v1576_v43 = vadd.f32 %v3712_v44, %v1247_v37  ;;  %v2793_v35 = vld [vmem:[%s4160_s0 + $0x3c4] sm:$0xf]  ;;  %v2271_v42 = vld [vmem:[%s4160_s0 + $0x1a0] sm:$0xf] }
 0x1a1   :  { %v1419_v45 = vadd.f32 %v1418_v53, %v1090_v40  ;;  %1128 = vmatmul.bf16.gmra.mxu0 %v2256_v27  ;;  %v1753_v46 = vmax.f32 %v1576_v43, 0.0  ;;  %1288 = vmatmul.bf16.gmra.mxu2 %v2512_v30  ;;  %v2725_v53 = vld [vmem:[%s4160_s0 + $0x1a4] sm:$0xf]  ;;  %v2726_v30 = vld [vmem:[%s4160_s0 + $0x1a4] sm:$0xf0] }
 0x1a2   :  { %v3807_v47 = vpop.f32.mrf.mxu3  ;;  %v2276_v51 = vor.u32 %v2725_v53, %v2273_v57 }
 0x1a3   :  { %v1690_v49 = vmax.f32 %v1419_v45, 0.0  ;;  %v1881_v48 = vpack.c.bf16 %v1753_v46, %v1753_v46  ;;  %v2527_v45 = vld [vmem:[%s4160_s0 + $0x3a0] sm:$0xf]  ;;  %v2790_v46 = vld [vmem:[%s4160_s0 + $0x3a4] sm:$0xf0] }
 0x1a4   :  { %v1425_v39 = vpop.f32.mrf.mxu1  ;;  %v1249_v41 = vpop.f32.mrf.mxu2 }
 0x1a5   :  { %v1818_v52 = vpack.c.bf16 %v1690_v49, %v1690_v49  ;;  %2010 = vst.msk [vmem:[#allocation2 + $0x17c] sm:$0xf] %vm1914_vm3, %v1881_v48  ;;  %v1250_v50 = vadd.f32 %v3639_v11, %v1249_v41  ;;  %v2548_v49 = vor.u32 %v2793_v35, %v2545_v38  ;;  %v2272_v41 = vor.u32 %v2726_v30, %v2271_v42 }
 0x1a6   :  { %v1091_v56 = vpop.f32.mrf.mxu0 }
 0x1a7   :  { %1947 = vst.msk [vmem:[#allocation2 + $0x80] sm:$0xf] %vm1914_vm3, %v1818_v52  ;;  %v1092_v44 = vadd.f32 %v3639_v11, %v1091_v56  ;;  %v1579_v60 = vadd.f32 %v3727_v34, %v1250_v50 }
 0x1a9   :  { %v1421_v2 = vadd.f32 %v1420_v10, %v1092_v44  ;;  %v1754_v62 = vmax.f32 %v1579_v60, 0.0  ;;  %v2528_v44 = vor.u32 %v2790_v46, %v2527_v45  ;;  %v2297_v46 = vld [vmem:[%s4160_s0 + $0x1d8] sm:$0xf0] }
 0x1aa   :  { %v3832_v34 = vpop.f32.mrf.mxu3 }
 0x1ab   :  { %v1691_v61 = vmax.f32 %v1421_v2, 0.0  ;;  %v1882_v10 = vpack.c.bf16 %v1754_v62, %v1754_v62 }
 0x1ac   :  { %v1428_v3 = vpop.f32.mrf.mxu1  ;;  %v1251_v14 = vpop.f32.mrf.mxu2 }
 0x1ad   :  { %v1819_v9 = vpack.c.bf16 %v1691_v61, %v1691_v61  ;;  %2011 = vst.msk [vmem:[#allocation2 + $0x180] sm:$0xf] %vm1914_vm3, %v1882_v10  ;;  %v1252_v12 = vadd.f32 %v3639_v11, %v1251_v14  ;;  %v2553_v14 = vld [vmem:[%s4160_s0 + $0x3d8] sm:$0xf0] }
 0x1ae   :  { %v1094_v18 = vpop.f32.mrf.mxu0 }
 0x1af   :  { %2635 = vmatmul.msk.bf16.gmra.mxu1 %vm800_vm2, %v2276_v51  ;;  %1948 = vst.msk [vmem:[#allocation2 + $0x84] sm:$0xf] %vm1914_vm3, %v1819_v9  ;;  %v1095_v16 = vadd.f32 %v3639_v11, %v1094_v18  ;;  %2668 = vmatmul.msk.bf16.gmra.mxu3 %vm800_vm2, %v2540_v8  ;;  %v1581_v19 = vadd.f32 %v3752_v20, %v1252_v12  ;;  %v2795_v9 = vld [vmem:[%s4160_s0 + $0x3d4] sm:$0xf]  ;;  %v2279_v18 = vld [vmem:[%s4160_s0 + $0x1b0] sm:$0xf] }
 0x1b1   :  { %v1424_v21 = vadd.f32 %v1423_v29, %v1095_v16  ;;  %1133 = vmatmul.bf16.gmra.mxu0 %v2264_v1  ;;  %v1755_v0 = vmax.f32 %v1581_v19, 0.0  ;;  %1293 = vmatmul.bf16.gmra.mxu2 %v2520_v5  ;;  %v2727_v29 = vld [vmem:[%s4160_s0 + $0x1b4] sm:$0xf]  ;;  %v2728_v5 = vld [vmem:[%s4160_s0 + $0x1b4] sm:$0xf0] }
 0x1b2   :  { %v3847_v22 = vpop.f32.mrf.mxu3  ;;  %v2284_v37 = vor.u32 %v2727_v29, %v2281_v32 }
 0x1b3   :  { %v1692_v24 = vmax.f32 %v1424_v21, 0.0  ;;  %v1883_v23 = vpack.c.bf16 %v1755_v0, %v1755_v0  ;;  %v2535_v21 = vld [vmem:[%s4160_s0 + $0x3b0] sm:$0xf]  ;;  %v2792_v0 = vld [vmem:[%s4160_s0 + $0x3b4] sm:$0xf0] }
 0x1b4   :  { %v1430_v13 = vpop.f32.mrf.mxu1  ;;  %v1254_v17 = vpop.f32.mrf.mxu2 }
 0x1b5   :  { %v1820_v28 = vpack.c.bf16 %v1692_v24, %v1692_v24  ;;  %2012 = vst.msk [vmem:[#allocation2 + $0x184] sm:$0xf] %vm1914_vm3, %v1883_v23  ;;  %v1255_v25 = vadd.f32 %v3639_v11, %v1254_v17  ;;  %v2556_v24 = vor.u32 %v2795_v9, %v2553_v14  ;;  %v2280_v17 = vor.u32 %v2728_v5, %v2279_v18 }
 0x1b6   :  { %v1096_v31 = vpop.f32.mrf.mxu0 }
 0x1b7   :  { %1949 = vst.msk [vmem:[#allocation2 + $0x88] sm:$0xf] %vm1914_vm3, %v1820_v28  ;;  %v1097_v20 = vadd.f32 %v3639_v11, %v1096_v31  ;;  %v1584_v36 = vadd.f32 %v3767_v7, %v1255_v25 }
 0x1b9   :  { %v1426_v55 = vadd.f32 %v1425_v39, %v1097_v20  ;;  %v1756_v27 = vmax.f32 %v1584_v36, 0.0  ;;  %v2536_v20 = vor.u32 %v2792_v0, %v2535_v21  ;;  %v2305_v0 = vld [vmem:[%s4160_s0 + $0x1e8] sm:$0xf0] }
 0x1ba   :  { %v3872_v7 = vpop.f32.mrf.mxu3 }
 0x1bb   :  { %v1693_v40 = vmax.f32 %v1426_v55, 0.0  ;;  %v1884_v39 = vpack.c.bf16 %v1756_v27, %v1756_v27 }
 0x1bc   :  { %v1433_v43 = vpop.f32.mrf.mxu1  ;;  %v1256_v52 = vpop.f32.mrf.mxu2 }
 0x1bd   :  { %v1821_v48 = vpack.c.bf16 %v1693_v40, %v1693_v40  ;;  %2013 = vst.msk [vmem:[#allocation2 + $0x188] sm:$0xf] %vm1914_vm3, %v1884_v39  ;;  %v1257_v50 = vadd.f32 %v3639_v11, %v1256_v52  ;;  %v2561_v52 = vld [vmem:[%s4160_s0 + $0x3e8] sm:$0xf0] }
 0x1be   :  { %v1099_v56 = vpop.f32.mrf.mxu0 }
 0x1bf   :  { %2636 = vmatmul.msk.bf16.gmra.mxu1 %vm800_vm2, %v2284_v37  ;;  %1950 = vst.msk [vmem:[#allocation2 + $0x8c] sm:$0xf] %vm1914_vm3, %v1821_v48  ;;  %v1100_v53 = vadd.f32 %v3639_v11, %v1099_v56  ;;  %2669 = vmatmul.msk.bf16.gmra.mxu3 %vm800_vm2, %v2548_v49  ;;  %v1586_v57 = vadd.f32 %v3792_v58, %v1257_v50  ;;  %v2797_v48 = vld [vmem:[%s4160_s0 + $0x3e4] sm:$0xf]  ;;  %v2287_v56 = vld [vmem:[%s4160_s0 + $0x1c0] sm:$0xf] }
 0x1c1   :  { %v1429_v60 = vadd.f32 %v1428_v3, %v1100_v53  ;;  %1138 = vmatmul.bf16.gmra.mxu0 %v2272_v41  ;;  %v1757_v2 = vmax.f32 %v1586_v57, 0.0  ;;  %1298 = vmatmul.bf16.gmra.mxu2 %v2528_v44  ;;  %v2729_v3 = vld [vmem:[%s4160_s0 + $0x1c4] sm:$0xf]  ;;  %v2730_v44 = vld [vmem:[%s4160_s0 + $0x1c4] sm:$0xf0] }
 0x1c2   :  { %v3887_v26 = vpop.f32.mrf.mxu3  ;;  %v2292_v12 = vor.u32 %v2729_v3, %v2289_v6 }
 0x1c3   :  { %v1694_v59 = vmax.f32 %v1429_v60, 0.0  ;;  %v1885_v51 = vpack.c.bf16 %v1757_v2, %v1757_v2  ;;  %v2543_v60 = vld [vmem:[%s4160_s0 + $0x3c0] sm:$0xf]  ;;  %v2794_v2 = vld [vmem:[%s4160_s0 + $0x3c4] sm:$0xf0] }
 0x1c4   :  { %v1435_v62 = vpop.f32.mrf.mxu1  ;;  %v1259_v54 = vpop.f32.mrf.mxu2 }
 0x1c5   :  { %v1822_v63 = vpack.c.bf16 %v1694_v59, %v1694_v59  ;;  %2014 = vst.msk [vmem:[#allocation2 + $0x18c] sm:$0xf] %vm1914_vm3, %v1885_v51  ;;  %v1260_v61 = vadd.f32 %v3639_v11, %v1259_v54  ;;  %v2564_v59 = vor.u32 %v2797_v48, %v2561_v52  ;;  %v2288_v54 = vor.u32 %v2730_v44, %v2287_v56 }
 0x1c6   :  { %v1101_v4 = vpop.f32.mrf.mxu0 }
 0x1c7   :  { %1951 = vst.msk [vmem:[#allocation2 + $0x90] sm:$0xf] %vm1914_vm3, %v1822_v63  ;;  %v1102_v58 = vadd.f32 %v3639_v11, %v1101_v4  ;;  %v1589_v8 = vadd.f32 %v3807_v47, %v1260_v61 }
 0x1c9   :  { %v1431_v10 = vadd.f32 %v1430_v13, %v1102_v58  ;;  %v1758_v1 = vmax.f32 %v1589_v8, 0.0  ;;  %v2544_v58 = vor.u32 %v2794_v2, %v2543_v60  ;;  %v2313_v2 = vld [vmem:[%s4160_s0 + $0x1f8] sm:$0xf0] }
 0x1ca   :  { %v3912_v47 = vpop.f32.mrf.mxu3 }
 0x1cb   :  { %v1695_v16 = vmax.f32 %v1431_v10, 0.0  ;;  %v1886_v13 = vpack.c.bf16 %v1758_v1, %v1758_v1 }
 0x1cc   :  { %v1438_v19 = vpop.f32.mrf.mxu1  ;;  %v1261_v28 = vpop.f32.mrf.mxu2 }
 0x1cd   :  { %v1823_v23 = vpack.c.bf16 %v1695_v16, %v1695_v16  ;;  %2015 = vst.msk [vmem:[#allocation2 + $0x190] sm:$0xf] %vm1914_vm3, %v1886_v13  ;;  %v1262_v25 = vadd.f32 %v3639_v11, %v1261_v28  ;;  %v2569_v28 = vld [vmem:[%s4160_s0 + $0x3f8] sm:$0xf0] }
 0x1ce   :  { %v1104_v31 = vpop.f32.mrf.mxu0 }
 0x1cf   :  { %2637 = vmatmul.msk.bf16.gmra.mxu1 %vm800_vm2, %v2292_v12  ;;  %1952 = vst.msk [vmem:[#allocation2 + $0x94] sm:$0xf] %vm1914_vm3, %v1823_v23  ;;  %v1105_v29 = vadd.f32 %v3639_v11, %v1104_v31  ;;  %2670 = vmatmul.msk.bf16.gmra.mxu3 %vm800_vm2, %v2556_v24  ;;  %v1591_v32 = vadd.f32 %v3832_v34, %v1262_v25  ;;  %v2799_v23 = vld [vmem:[%s4160_s0 + $0x3f4] sm:$0xf]  ;;  %v2295_v31 = vld [vmem:[%s4160_s0 + $0x1d0] sm:$0xf] }
 0x1d1   :  { %v1434_v36 = vadd.f32 %v1433_v43, %v1105_v29  ;;  %1143 = vmatmul.bf16.gmra.mxu0 %v2280_v17  ;;  %v1759_v55 = vmax.f32 %v1591_v32, 0.0  ;;  %1303 = vmatmul.bf16.gmra.mxu2 %v2536_v20  ;;  %v2731_v43 = vld [vmem:[%s4160_s0 + $0x1d4] sm:$0xf]  ;;  %v2732_v20 = vld [vmem:[%s4160_s0 + $0x1d4] sm:$0xf0] }
 0x1d2   :  { %v3927_v35 = vpop.f32.mrf.mxu3  ;;  %v2300_v50 = vor.u32 %v2731_v43, %v2297_v46  ;;  %v2551_v32 = vld [vmem:[%s4160_s0 + $0x3d0] sm:$0xf] }
 0x1d3   :  { %v1696_v38 = vmax.f32 %v1434_v36, 0.0  ;;  %v1887_v37 = vpack.c.bf16 %v1759_v55, %v1759_v55  ;;  %v2796_v36 = vld [vmem:[%s4160_s0 + $0x3d4] sm:$0xf0] }
 0x1d4   :  { %v1440_v27 = vpop.f32.mrf.mxu1  ;;  %v1264_v30 = vpop.f32.mrf.mxu2 }
 0x1d5   :  { %v1824_v42 = vpack.c.bf16 %v1696_v38, %v1696_v38  ;;  %2016 = vst.msk [vmem:[#allocation2 + $0x194] sm:$0xf] %vm1914_vm3, %v1887_v37  ;;  %v1265_v40 = vadd.f32 %v3639_v11, %v1264_v30  ;;  %v2572_v38 = vor.u32 %v2799_v23, %v2569_v28  ;;  %v2296_v30 = vor.u32 %v2732_v20, %v2295_v31  ;;  %v2321_v20 = vld [vmem:[%s4160_s0 + $0x208] sm:$0xf0] }
 0x1d6   :  { %v1106_v45 = vpop.f32.mrf.mxu0 }
 0x1d7   :  { %1953 = vst.msk [vmem:[#allocation2 + $0x98] sm:$0xf] %vm1914_vm3, %v1824_v42  ;;  %v1107_v34 = vadd.f32 %v3639_v11, %v1106_v45  ;;  %v1594_v49 = vadd.f32 %v3847_v22, %v1265_v40 }
 0x1d9   :  { %v1436_v39 = vadd.f32 %v1435_v62, %v1107_v34  ;;  %v1760_v41 = vmax.f32 %v1594_v49, 0.0  ;;  %v2552_v34 = vor.u32 %v2796_v36, %v2551_v32 }
 0x1da   :  { %v3952_v22 = vpop.f32.mrf.mxu3 }
 0x1db   :  { %v1697_v53 = vmax.f32 %v1436_v39, 0.0  ;;  %v1888_v62 = vpack.c.bf16 %v1760_v41, %v1760_v41 }
 0x1dc   :  { %v1443_v57 = vpop.f32.mrf.mxu1  ;;  %v1266_v63 = vpop.f32.mrf.mxu2 }
 0x1dd   :  { %v1825_v51 = vpack.c.bf16 %v1697_v53, %v1697_v53  ;;  %2017 = vst.msk [vmem:[#allocation2 + $0x198] sm:$0xf] %vm1914_vm3, %v1888_v62  ;;  %v1267_v61 = vadd.f32 %v3639_v11, %v1266_v63 }
 0x1de   :  { %v1109_v4 = vpop.f32.mrf.mxu0 }
 0x1df   :  { %2638 = vmatmul.msk.bf16.gmra.mxu1 %vm800_vm2, %v2300_v50  ;;  %1954 = vst.msk [vmem:[#allocation2 + $0x9c] sm:$0xf] %vm1914_vm3, %v1825_v51  ;;  %v1110_v3 = vadd.f32 %v3639_v11, %v1109_v4  ;;  %2671 = vmatmul.msk.bf16.gmra.mxu3 %vm800_vm2, %v2564_v59  ;;  %v1596_v6 = vadd.f32 %v3872_v7, %v1267_v61  ;;  %v2734_v61 = vld [vmem:[%s4160_s0 + $0x1e4] sm:$0xf0] }
 0x1e1   :  { %v1439_v8 = vadd.f32 %v1438_v19, %v1110_v3  ;;  %1148 = vmatmul.bf16.gmra.mxu0 %v2288_v54  ;;  %v1761_v10 = vmax.f32 %v1596_v6, 0.0  ;;  %1308 = vmatmul.bf16.gmra.mxu2 %v2544_v58  ;;  %v2733_v19 = vld [vmem:[%s4160_s0 + $0x1e4] sm:$0xf]  ;;  %v2303_v54 = vld [vmem:[%s4160_s0 + $0x1e0] sm:$0xf] }
 0x1e2   :  { %v3967_v9 = vpop.f32.mrf.mxu3  ;;  %v2308_v25 = vor.u32 %v2733_v19, %v2305_v0  ;;  %v2559_v3 = vld [vmem:[%s4160_s0 + $0x3e0] sm:$0xf] }
 0x1e3   :  { %v1698_v14 = vmax.f32 %v1439_v8, 0.0  ;;  %v1889_v12 = vpack.c.bf16 %v1761_v10, %v1761_v10 }
 0x1e4   :  { %v1445_v1 = vpop.f32.mrf.mxu1  ;;  %v1269_v5 = vpop.f32.mrf.mxu2 }
 0x1e5   :  { %v1826_v18 = vpack.c.bf16 %v1698_v14, %v1698_v14  ;;  %2018 = vst.msk [vmem:[#allocation2 + $0x19c] sm:$0xf] %vm1914_vm3, %v1889_v12  ;;  %v1270_v16 = vadd.f32 %v3639_v11, %v1269_v5  ;;  %v2304_v14 = vor.u32 %v2734_v61, %v2303_v54 }
 0x1e6   :  { %v1111_v21 = vpop.f32.mrf.mxu0 }
 0x1e7   :  { %1955 = vst.msk [vmem:[#allocation2 + $0xa0] sm:$0xf] %vm1914_vm3, %v1826_v18  ;;  %v1112_v7 = vadd.f32 %v3639_v11, %v1111_v21  ;;  %v1599_v24 = vadd.f32 %v3887_v26, %v1270_v16 }
 0x1e9   :  { %v1441_v13 = vadd.f32 %v1440_v27, %v1112_v7  ;;  %v1762_v17 = vmax.f32 %v1599_v24, 0.0 }
 0x1ea   :  { %v3998_v55 = vpop.f32.mrf.mxu3 }
 0x1eb   :  { %v1699_v26 = vmax.f32 %v1441_v13, 0.0  ;;  %v1890_v27 = vpack.c.bf16 %v1762_v17, %v1762_v17 }
 0x1ec   :  { %v1448_v29 = vpop.f32.mrf.mxu1  ;;  %v1271_v42 = vpop.f32.mrf.mxu2 }
 0x1ed   :  { %v1827_v37 = vpack.c.bf16 %v1699_v26, %v1699_v26  ;;  %2019 = vst.msk [vmem:[#allocation2 + $0x1a0] sm:$0xf] %vm1914_vm3, %v1890_v27  ;;  %v1272_v40 = vadd.f32 %v3639_v11, %v1271_v42  ;;  %v2311_v27 = vld [vmem:[%s4160_s0 + $0x1f0] sm:$0xf] }
 0x1ee   :  { %v1114_v45 = vpop.f32.mrf.mxu0 }
 0x1ef   :  { %2639 = vmatmul.msk.bf16.gmra.mxu1 %vm800_vm2, %v2308_v25  ;;  %1956 = vst.msk [vmem:[#allocation2 + $0xa4] sm:$0xf] %vm1914_vm3, %v1827_v37  ;;  %v1115_v43 = vadd.f32 %v3639_v11, %v1114_v45  ;;  %2672 = vmatmul.msk.bf16.gmra.mxu3 %vm800_vm2, %v2572_v38  ;;  %v1601_v46 = vadd.f32 %v3912_v47, %v1272_v40  ;;  %v2736_v37 = vld [vmem:[%s4160_s0 + $0x1f4] sm:$0xf0]  ;;  %v2567_v40 = vld [vmem:[%s4160_s0 + $0x3f0] sm:$0xf] }
 0x1f1   :  { %v1444_v49 = vadd.f32 %v1443_v57, %v1115_v43  ;;  %1153 = vmatmul.bf16.gmra.mxu0 %v2296_v30  ;;  %v1763_v39 = vmax.f32 %v1601_v46, 0.0  ;;  %1313 = vmatmul.bf16.gmra.mxu2 %v2552_v34  ;;  %v2735_v57 = vld [vmem:[%s4160_s0 + $0x1f4] sm:$0xf]  ;;  %v2312_v46 = vor.u32 %v2736_v37, %v2311_v27 }
 0x1f2   :  { %v4007_v44 = vpop.f32.mrf.mxu3  ;;  %v2316_v63 = vor.u32 %v2735_v57, %v2313_v2 }
 0x1f3   :  { %v1700_v48 = vmax.f32 %v1444_v49, 0.0  ;;  %v1891_v41 = vpack.c.bf16 %v1763_v39, %v1763_v39 }
 0x1f4   :  { %v1450_v52 = vpop.f32.mrf.mxu1  ;;  %v1274_v56 = vpop.f32.mrf.mxu2 }
 0x1f5   :  { %v1828_v50 = vpack.c.bf16 %v1700_v48, %v1700_v48  ;;  %2020 = vst.msk [vmem:[#allocation2 + $0x1a4] sm:$0xf] %vm1914_vm3, %v1891_v41  ;;  %v1275_v53 = vadd.f32 %v3639_v11, %v1274_v56 }
 0x1f6   :  { %v1116_v60 = vpop.f32.mrf.mxu0 }
 0x1f7   :  { %1957 = vst.msk [vmem:[#allocation2 + $0xa8] sm:$0xf] %vm1914_vm3, %v1828_v50  ;;  %v1117_v47 = vadd.f32 %v3639_v11, %v1116_v60  ;;  %v1604_v59 = vadd.f32 %v3927_v35, %v1275_v53  ;;  %v2798_v35 = vld [vmem:[%s4160_s0 + $0x3e4] sm:$0xf0] }
 0x1f8   :  { %v2560_v18 = vor.u32 %v2798_v35, %v2559_v3 }
 0x1f9   :  { %v1446_v62 = vadd.f32 %v1445_v1, %v1117_v47  ;;  %v1764_v51 = vmax.f32 %v1604_v59, 0.0 }
 0x1fa   :  { %v4037_v16 = vpop.f32.mrf.mxu3 }
 0x1fb   :  { %v1701_v4 = vmax.f32 %v1446_v62, 0.0  ;;  %v1892_v6 = vpack.c.bf16 %v1764_v51, %v1764_v51 }
 0x1fc   :  { %v1453_v58 = vpop.f32.mrf.mxu1  ;;  %v1276_v10 = vpop.f32.mrf.mxu2 }
 0x1fd   :  { %v1829_v8 = vpack.c.bf16 %v1701_v4, %v1701_v4  ;;  %2021 = vst.msk [vmem:[#allocation2 + $0x1a8] sm:$0xf] %vm1914_vm3, %v1892_v6  ;;  %v1277_v1 = vadd.f32 %v3639_v11, %v1276_v10 }
 0x1fe   :  { %v1119_v12 = vpop.f32.mrf.mxu0 }
 0x1ff   :  { %2640 = vmatmul.msk.bf16.gmra.mxu1 %vm800_vm2, %v2316_v63  ;;  %1958 = vst.msk [vmem:[#allocation2 + $0xac] sm:$0xf] %vm1914_vm3, %v1829_v8  ;;  %v1120_v5 = vadd.f32 %v3639_v11, %v1119_v12  ;;  %v1606_v21 = vadd.f32 %v3952_v22, %v1277_v1  ;;  %v2737_v22 = vld [vmem:[%s4160_s0 + $0x204] sm:$0xf] }
 0x200   :  { %v2324_v38 = vor.u32 %v2737_v22, %v2321_v20 }
 0x201   :  { %v1449_v7 = vadd.f32 %v1448_v29, %v1120_v5  ;;  %1158 = vmatmul.bf16.gmra.mxu0 %v2304_v14  ;;  %v1765_v19 = vmax.f32 %v1606_v21, 0.0  ;;  %1318 = vmatmul.bf16.gmra.mxu2 %v2560_v18 }
 0x202   :  { %v4051_v32 = vpop.f32.mrf.mxu3 }
 0x203   :  { %v1702_v0 = vmax.f32 %v1449_v7, 0.0  ;;  %v1893_v13 = vpack.c.bf16 %v1765_v19, %v1765_v19 }
 0x204   :  { %v1455_v24 = vpop.f32.mrf.mxu1  ;;  %v1279_v28 = vpop.f32.mrf.mxu2 }
 0x205   :  { %v1830_v23 = vpack.c.bf16 %v1702_v0, %v1702_v0  ;;  %2022 = vst.msk [vmem:[#allocation2 + $0x1ac] sm:$0xf] %vm1914_vm3, %v1893_v13  ;;  %v1280_v17 = vadd.f32 %v3639_v11, %v1279_v28 }
 0x206   :  { %v1121_v25 = vpop.f32.mrf.mxu0 }
 0x207   :  { %1959 = vst.msk [vmem:[#allocation2 + $0xb0] sm:$0xf] %vm1914_vm3, %v1830_v23  ;;  %v1122_v31 = vadd.f32 %v3639_v11, %v1121_v25  ;;  %v1609_v26 = vadd.f32 %v3967_v9, %v1280_v17  ;;  %v2800_v9 = vld [vmem:[%s4160_s0 + $0x3f4] sm:$0xf0] }
 0x208   :  { %v2568_v48 = vor.u32 %v2800_v9, %v2567_v40 }
 0x209   :  { %v1451_v29 = vadd.f32 %v1450_v52, %v1122_v31  ;;  %v1766_v36 = vmax.f32 %v1609_v26, 0.0 }
 0x20a   :  { %v1620_v47 = vpop.f32.mrf.mxu3 }
 0x20b   :  { %v1703_v42 = vmax.f32 %v1451_v29, 0.0  ;;  %v1894_v45 = vpack.c.bf16 %v1766_v36, %v1766_v36 }
 0x20c   :  { %v1458_v30 = vpop.f32.mrf.mxu1  ;;  %v1281_v43 = vpop.f32.mrf.mxu2 }
 0x20d   :  { %v1831_v34 = vpack.c.bf16 %v1703_v42, %v1703_v42  ;;  %2023 = vst.msk [vmem:[#allocation2 + $0x1b0] sm:$0xf] %vm1914_vm3, %v1894_v45  ;;  %v1282_v49 = vadd.f32 %v3639_v11, %v1281_v43 }
 0x20e   :  { %v1124_v39 = vpop.f32.mrf.mxu0 }
 0x20f   :  { %2641 = vmatmul.msk.bf16.gmra.mxu1 %vm800_vm2, %v2324_v38  ;;  %1960 = vst.msk [vmem:[#allocation2 + $0xb4] sm:$0xf] %vm1914_vm3, %v1831_v34  ;;  %v1125_v52 = vadd.f32 %v3639_v11, %v1124_v39  ;;  %v1611_v41 = vadd.f32 %v3998_v55, %v1282_v49 }
 0x211   :  { %v1454_v50 = vadd.f32 %v1453_v58, %v1125_v52  ;;  %1163 = vmatmul.bf16.gmra.mxu0 %v2312_v46  ;;  %v1767_v56 = vmax.f32 %v1611_v41, 0.0  ;;  %1323 = vmatmul.bf16.gmra.mxu2 %v2568_v48 }
 0x212   :  { %v1623_v8 = vpop.f32.mrf.mxu3 }
 0x213   :  { %v1704_v53 = vmax.f32 %v1454_v50, 0.0  ;;  %v1895_v57 = vpack.c.bf16 %v1767_v56, %v1767_v56 }
 0x214   :  { %v1460_v60 = vpop.f32.mrf.mxu1  ;;  %v1284_v59 = vpop.f32.mrf.mxu2 }
 0x215   :  { %v1832_v2 = vpack.c.bf16 %v1704_v53, %v1704_v53  ;;  %2024 = vst.msk [vmem:[#allocation2 + $0x1b4] sm:$0xf] %vm1914_vm3, %v1895_v57  ;;  %v1285_v62 = vadd.f32 %v3639_v11, %v1284_v59 }
 0x216   :  { %v1126_v51 = vpop.f32.mrf.mxu0 }
 0x217   :  { %1961 = vst.msk [vmem:[#allocation2 + $0xb8] sm:$0xf] %vm1914_vm3, %v1832_v2  ;;  %v1127_v63 = vadd.f32 %v3639_v11, %v1126_v51  ;;  %v1614_v55 = vadd.f32 %v4007_v44, %v1285_v62 }
 0x219   :  { %v1456_v54 = vadd.f32 %v1455_v24, %v1127_v63  ;;  %v1768_v61 = vmax.f32 %v1614_v55, 0.0  ;;  %v4085_v24 = vld [vmem:[%s4162_s2] ss:$0 sm:$0xff]  ;;  %s2854_s2 = smov [#allocation2]  }
 0x21a   :  { %s2047_s18 = sshll.u32 %s2854_s2, 4  ;;  %s2048_s18 = int_to_ptr.vmem [resolvable:$true] %s2047_s18 }
 0x21b   :  { %v1705_v4 = vmax.f32 %v1456_v54, 0.0  ;;  %v1896_v3 = vpack.c.bf16 %v1768_v61, %v1768_v61 }
 0x21c   :  { %v1463_v58 = vpop.f32.mrf.mxu1  ;;  %v1286_v6 = vpop.f32.mrf.mxu2 }
 0x21d   :  { %v1833_v35 = vpack.c.bf16 %v1705_v4, %v1705_v4  ;;  %2025 = vst.msk [vmem:[#allocation2 + $0x1b8] sm:$0xf] %vm1914_vm3, %v1896_v3  ;;  %v1287_v10 = vadd.f32 %v3639_v11, %v1286_v6 }
 0x21e   :  { %v1129_v14 = vpop.f32.mrf.mxu0 }
 0x21f   :  { %1962 = vst.msk [vmem:[#allocation2 + $0xbc] sm:$0xf] %vm1914_vm3, %v1833_v35  ;;  %v1130_v1 = vadd.f32 %v3639_v11, %v1129_v14  ;;  %v1616_v12 = vadd.f32 %v4037_v16, %v1287_v10  ;;  %v1625_v16 = vpop.f32.mrf.mxu3 }
 0x221   :  { %v1459_v44 = vadd.f32 %v1458_v30, %v1130_v1  ;;  %v1769_v18 = vmax.f32 %v1616_v12, 0.0 }
 0x223   :  { %v1706_v5 = vmax.f32 %v1459_v44, 0.0  ;;  %v1897_v7 = vpack.c.bf16 %v1769_v18, %v1769_v18 }
 0x224   :  { %v1465_v21 = vpop.f32.mrf.mxu1  ;;  %v1289_v0 = vpop.f32.mrf.mxu2 }
 0x225   :  { %v1834_v19 = vpack.c.bf16 %v1706_v5, %v1706_v5  ;;  %2026 = vst.msk [vmem:[#allocation2 + $0x1bc] sm:$0xf] %vm1914_vm3, %v1897_v7  ;;  %v1290_v13 = vadd.f32 %v4085_v24, %v1289_v0 }
 0x226   :  { %v1131_v23 = vpop.f32.mrf.mxu0 }
 0x227   :  { %1963 = vst.msk [vmem:[#allocation2 + $0xc0] sm:$0xf] %vm1914_vm3, %v1834_v19  ;;  %v1132_v11 = vadd.f32 %v4085_v24, %v1131_v23  ;;  %v1619_v28 = vadd.f32 %v4051_v32, %v1290_v13  ;;  %v1628_v30 = vpop.f32.mrf.mxu3 }
 0x229   :  { %v1461_v17 = vadd.f32 %v1460_v60, %v1132_v11  ;;  %v1770_v25 = vmax.f32 %v1619_v28, 0.0 }
 0x22b   :  { %v1707_v31 = vmax.f32 %v1461_v17, 0.0  ;;  %v1898_v20 = vpack.c.bf16 %v1770_v25, %v1770_v25 }
 0x22c   :  { %v1468_v22 = vpop.f32.mrf.mxu1  ;;  %v1291_v29 = vpop.f32.mrf.mxu2 }
 0x22d   :  { %v1835_v26 = vpack.c.bf16 %v1707_v31, %v1707_v31  ;;  %2027 = vst.msk [vmem:[#allocation2 + $0x1c0] sm:$0xf] %vm1914_vm3, %v1898_v20  ;;  %v1292_v36 = vadd.f32 %v4085_v24, %v1291_v29 }
 0x22e   :  { %v1134_v38 = vpop.f32.mrf.mxu0 }
 0x22f   :  { %1964 = vst.msk [vmem:[#allocation2 + $0xc4] sm:$0xf] %vm1914_vm3, %v1835_v26  ;;  %v1135_v27 = vadd.f32 %v4085_v24, %v1134_v38  ;;  %v1621_v37 = vadd.f32 %v1620_v47, %v1292_v36  ;;  %v1630_v53 = vpop.f32.mrf.mxu3 }
 0x231   :  { %v1464_v42 = vadd.f32 %v1463_v58, %v1135_v27  ;;  %v1771_v32 = vmax.f32 %v1621_v37, 0.0 }
 0x233   :  { %v1708_v40 = vmax.f32 %v1464_v42, 0.0  ;;  %v1899_v45 = vpack.c.bf16 %v1771_v32, %v1771_v32 }
 0x234   :  { %v1470_v9 = vpop.f32.mrf.mxu1  ;;  %v1294_v43 = vpop.f32.mrf.mxu2 }
 0x235   :  { %v1836_v34 = vpack.c.bf16 %v1708_v40, %v1708_v40  ;;  %2028 = vst.msk [vmem:[#allocation2 + $0x1c4] sm:$0xf] %vm1914_vm3, %v1899_v45  ;;  %v1295_v46 = vadd.f32 %v4085_v24, %v1294_v43 }
 0x236   :  { %v1136_v49 = vpop.f32.mrf.mxu0 }
 0x237   :  { %1965 = vst.msk [vmem:[#allocation2 + $0xc8] sm:$0xf] %vm1914_vm3, %v1836_v34  ;;  %v1137_v39 = vadd.f32 %v4085_v24, %v1136_v49  ;;  %v1624_v48 = vadd.f32 %v1623_v8, %v1295_v46  ;;  %v1633_v35 = vpop.f32.mrf.mxu3 }
 0x239   :  { %v1466_v52 = vadd.f32 %v1465_v21, %v1137_v39  ;;  %v1772_v41 = vmax.f32 %v1624_v48, 0.0 }
 0x23b   :  { %v1709_v50 = vmax.f32 %v1466_v52, 0.0  ;;  %v1900_v60 = vpack.c.bf16 %v1772_v41, %v1772_v41 }
 0x23c   :  { %v1473_v56 = vpop.f32.mrf.mxu1  ;;  %v1296_v57 = vpop.f32.mrf.mxu2 }
 0x23d   :  { %v1837_v47 = vpack.c.bf16 %v1709_v50, %v1709_v50  ;;  %2029 = vst.msk [vmem:[#allocation2 + $0x1c8] sm:$0xf] %vm1914_vm3, %v1900_v60  ;;  %v1297_v2 = vadd.f32 %v4085_v24, %v1296_v57 }
 0x23e   :  { %v1139_v59 = vpop.f32.mrf.mxu0 }
 0x23f   :  { %1966 = vst.msk [vmem:[#allocation2 + $0xcc] sm:$0xf] %vm1914_vm3, %v1837_v47  ;;  %v1140_v62 = vadd.f32 %v4085_v24, %v1139_v59  ;;  %v1626_v51 = vadd.f32 %v1625_v16, %v1297_v2  ;;  %v1635_v23 = vpop.f32.mrf.mxu3 }
 0x241   :  { %v1469_v63 = vadd.f32 %v1468_v22, %v1140_v62  ;;  %v1773_v55 = vmax.f32 %v1626_v51, 0.0 }
 0x243   :  { %v1710_v54 = vmax.f32 %v1469_v63, 0.0  ;;  %v1901_v4 = vpack.c.bf16 %v1773_v55, %v1773_v55 }
 0x244   :  { %v1475_v61 = vpop.f32.mrf.mxu1  ;;  %v1299_v3 = vpop.f32.mrf.mxu2 }
 0x245   :  { %v1838_v58 = vpack.c.bf16 %v1710_v54, %v1710_v54  ;;  %2030 = vst.msk [vmem:[#allocation2 + $0x1cc] sm:$0xf] %vm1914_vm3, %v1901_v4  ;;  %v1300_v6 = vadd.f32 %v4085_v24, %v1299_v3 }
 0x246   :  { %v1141_v8 = vpop.f32.mrf.mxu0 }
 0x247   :  { %1967 = vst.msk [vmem:[#allocation2 + $0xd0] sm:$0xf] %vm1914_vm3, %v1838_v58  ;;  %v1142_v10 = vadd.f32 %v4085_v24, %v1141_v8  ;;  %v1629_v14 = vadd.f32 %v1628_v30, %v1300_v6  ;;  %v1638_v37 = vpop.f32.mrf.mxu3 }
 0x249   :  { %v1471_v1 = vadd.f32 %v1470_v9, %v1142_v10  ;;  %v1774_v12 = vmax.f32 %v1629_v14, 0.0 }
 0x24b   :  { %v1711_v44 = vmax.f32 %v1471_v1, 0.0  ;;  %v1902_v5 = vpack.c.bf16 %v1774_v12, %v1774_v12 }
 0x24c   :  { %v1478_v18 = vpop.f32.mrf.mxu1  ;;  %v1301_v7 = vpop.f32.mrf.mxu2 }
 0x24d   :  { %v1839_v21 = vpack.c.bf16 %v1711_v44, %v1711_v44  ;;  %2031 = vst.msk [vmem:[#allocation2 + $0x1d0] sm:$0xf] %vm1914_vm3, %v1902_v5  ;;  %v1302_v19 = vadd.f32 %v4085_v24, %v1301_v7 }
 0x24e   :  { %v1144_v0 = vpop.f32.mrf.mxu0 }
 0x24f   :  { %1968 = vst.msk [vmem:[#allocation2 + $0xd4] sm:$0xf] %vm1914_vm3, %v1839_v21  ;;  %v1145_v13 = vadd.f32 %v4085_v24, %v1144_v0  ;;  %v1631_v11 = vadd.f32 %v1630_v53, %v1302_v19  ;;  %v1640_v50 = vpop.f32.mrf.mxu3 }
 0x251   :  { %v1474_v16 = vadd.f32 %v1473_v56, %v1145_v13  ;;  %v1775_v28 = vmax.f32 %v1631_v11, 0.0 }
 0x253   :  { %v1712_v17 = vmax.f32 %v1474_v16, 0.0  ;;  %v1903_v31 = vpack.c.bf16 %v1775_v28, %v1775_v28 }
 0x254   :  { %v1480_v25 = vpop.f32.mrf.mxu1  ;;  %v1304_v20 = vpop.f32.mrf.mxu2 }
 0x255   :  { %v1840_v22 = vpack.c.bf16 %v1712_v17, %v1712_v17  ;;  %2032 = vst.msk [vmem:[#allocation2 + $0x1d4] sm:$0xf] %vm1914_vm3, %v1903_v31  ;;  %v1305_v26 = vadd.f32 %v4085_v24, %v1304_v20 }
 0x256   :  { %v1146_v29 = vpop.f32.mrf.mxu0 }
 0x257   :  { %1969 = vst.msk [vmem:[#allocation2 + $0xd8] sm:$0xf] %vm1914_vm3, %v1840_v22  ;;  %v1147_v36 = vadd.f32 %v4085_v24, %v1146_v29  ;;  %v1634_v38 = vadd.f32 %v1633_v35, %v1305_v26  ;;  %v1643_v58 = vpop.f32.mrf.mxu3 }
 0x259   :  { %v1476_v27 = vadd.f32 %v1475_v61, %v1147_v36  ;;  %v1776_v42 = vmax.f32 %v1634_v38, 0.0 }
 0x25b   :  { %v1713_v30 = vmax.f32 %v1476_v27, 0.0  ;;  %v1904_v40 = vpack.c.bf16 %v1776_v42, %v1776_v42 }
 0x25c   :  { %v1483_v32 = vpop.f32.mrf.mxu1  ;;  %v1306_v45 = vpop.f32.mrf.mxu2 }
 0x25d   :  { %v1841_v9 = vpack.c.bf16 %v1713_v30, %v1713_v30  ;;  %2033 = vst.msk [vmem:[#allocation2 + $0x1d8] sm:$0xf] %vm1914_vm3, %v1904_v40  ;;  %v1307_v34 = vadd.f32 %v4085_v24, %v1306_v45 }
 0x25e   :  { %v1149_v43 = vpop.f32.mrf.mxu0 }
 0x25f   :  { %1970 = vst.msk [vmem:[#allocation2 + $0xdc] sm:$0xf] %vm1914_vm3, %v1841_v9  ;;  %v1150_v46 = vadd.f32 %v4085_v24, %v1149_v43  ;;  %v1636_v49 = vadd.f32 %v1635_v23, %v1307_v34  ;;  %v1645_v0 = vpop.f32.mrf.mxu3 }
 0x261   :  { %v1479_v39 = vadd.f32 %v1478_v18, %v1150_v46  ;;  %v1777_v48 = vmax.f32 %v1636_v49, 0.0  ;;  %v1170_v49 = vadd.f32 %v4085_v24, %v3167_v15 }
 0x263   :  { %v1714_v52 = vmax.f32 %v1479_v39, 0.0  ;;  %v1905_v56 = vpack.c.bf16 %v1777_v48, %v1777_v48 }
 0x264   :  { %v1485_v41 = vpop.f32.mrf.mxu1  ;;  %v1309_v60 = vpop.f32.mrf.mxu2 }
 0x265   :  { %v1842_v53 = vpack.c.bf16 %v1714_v52, %v1714_v52  ;;  %2034 = vst.msk [vmem:[#allocation2 + $0x1dc] sm:$0xf] %vm1914_vm3, %v1905_v56  ;;  %v1310_v47 = vadd.f32 %v4085_v24, %v1309_v60 }
 0x266   :  { %v1151_v57 = vpop.f32.mrf.mxu0 }
 0x267   :  { %1971 = vst.msk [vmem:[#allocation2 + $0xe0] sm:$0xf] %vm1914_vm3, %v1842_v53  ;;  %v1152_v2 = vadd.f32 %v4085_v24, %v1151_v57  ;;  %v1639_v59 = vadd.f32 %v1638_v37, %v1310_v47  ;;  %v1648_v38 = vpop.f32.mrf.mxu3 }
 0x269   :  { %v1481_v62 = vadd.f32 %v1480_v25, %v1152_v2  ;;  %v1778_v51 = vmax.f32 %v1639_v59, 0.0 }
 0x26b   :  { %v1715_v63 = vmax.f32 %v1481_v62, 0.0  ;;  %v1906_v54 = vpack.c.bf16 %v1778_v51, %v1778_v51 }
 0x26c   :  { %v1488_v55 = vpop.f32.mrf.mxu1  ;;  %v1311_v4 = vpop.f32.mrf.mxu2 }
 0x26d   :  { %v1843_v61 = vpack.c.bf16 %v1715_v63, %v1715_v63  ;;  %2035 = vst.msk [vmem:[#allocation2 + $0x1e0] sm:$0xf] %vm1914_vm3, %v1906_v54  ;;  %v1312_v3 = vadd.f32 %v4085_v24, %v1311_v4  ;;  %v1172_v63 = vadd.f32 %v4085_v24, %v3197_v33 }
 0x26e   :  { %v1154_v35 = vpop.f32.mrf.mxu0 }
 0x26f   :  { %1972 = vst.msk [vmem:[#allocation2 + $0xe4] sm:$0xf] %vm1914_vm3, %v1843_v61  ;;  %v1155_v6 = vadd.f32 %v4085_v24, %v1154_v35  ;;  %v1641_v8 = vadd.f32 %v1640_v50, %v1312_v3  ;;  %v1650_v52 = vpop.f32.mrf.mxu3 }
 0x271   :  { %v1484_v10 = vadd.f32 %v1483_v32, %v1155_v6  ;;  %v1779_v14 = vmax.f32 %v1641_v8, 0.0 }
 0x273   :  { %v1716_v1 = vmax.f32 %v1484_v10, 0.0  ;;  %v1907_v44 = vpack.c.bf16 %v1779_v14, %v1779_v14 }
 0x274   :  { %v1490_v12 = vpop.f32.mrf.mxu1  ;;  %v1314_v5 = vpop.f32.mrf.mxu2 }
 0x275   :  { %v1844_v18 = vpack.c.bf16 %v1716_v1, %v1716_v1  ;;  %2036 = vst.msk [vmem:[#allocation2 + $0x1e4] sm:$0xf] %vm1914_vm3, %v1907_v44  ;;  %v1315_v21 = vadd.f32 %v4085_v24, %v1314_v5 }
 0x276   :  { %v1156_v7 = vpop.f32.mrf.mxu0 }
 0x277   :  { %1973 = vst.msk [vmem:[#allocation2 + $0xe8] sm:$0xf] %vm1914_vm3, %v1844_v18  ;;  %v1157_v19 = vadd.f32 %v4085_v24, %v1156_v7  ;;  %v1644_v13 = vadd.f32 %v1643_v58, %v1315_v21  ;;  %v1653_v35 = vpop.f32.mrf.mxu3 }
 0x279   :  { %v1486_v23 = vadd.f32 %v1485_v41, %v1157_v19  ;;  %v1780_v11 = vmax.f32 %v1644_v13, 0.0 }
 0x27b   :  { %v1717_v16 = vmax.f32 %v1486_v23, 0.0  ;;  %v1908_v17 = vpack.c.bf16 %v1780_v11, %v1780_v11 }
 0x27c   :  { %v1493_v28 = vpop.f32.mrf.mxu1  ;;  %v1316_v31 = vpop.f32.mrf.mxu2 }
 0x27d   :  { %v1845_v25 = vpack.c.bf16 %v1717_v16, %v1717_v16  ;;  %2037 = vst.msk [vmem:[#allocation2 + $0x1e8] sm:$0xf] %vm1914_vm3, %v1908_v17  ;;  %v1317_v22 = vadd.f32 %v4085_v24, %v1316_v31 }
 0x27e   :  { %v1159_v20 = vpop.f32.mrf.mxu0 }
 0x27f   :  { %1974 = vst.msk [vmem:[#allocation2 + $0xec] sm:$0xf] %vm1914_vm3, %v1845_v25  ;;  %v1160_v26 = vadd.f32 %v4085_v24, %v1159_v20  ;;  %v1646_v29 = vadd.f32 %v1645_v0, %v1317_v22  ;;  %v1655_v13 = vpop.f32.mrf.mxu3 }
 0x281   :  { %v1489_v36 = vadd.f32 %v1488_v55, %v1160_v26  ;;  %v1781_v27 = vmax.f32 %v1646_v29, 0.0 }
 0x283   :  { %v1718_v37 = vmax.f32 %v1489_v36, 0.0  ;;  %v1909_v30 = vpack.c.bf16 %v1781_v27, %v1781_v27 }
 0x284   :  { %v1495_v42 = vpop.f32.mrf.mxu1  ;;  %v1319_v40 = vpop.f32.mrf.mxu2 }
 0x285   :  { %v1846_v32 = vpack.c.bf16 %v1718_v37, %v1718_v37  ;;  %2038 = vst.msk [vmem:[#allocation2 + $0x1ec] sm:$0xf] %vm1914_vm3, %v1909_v30  ;;  %v1320_v9 = vadd.f32 %v4085_v24, %v1319_v40 }
 0x286   :  { %v1161_v45 = vpop.f32.mrf.mxu0 }
 0x287   :  { %1975 = vst.msk [vmem:[#allocation2 + $0xf0] sm:$0xf] %vm1914_vm3, %v1846_v32  ;;  %v1162_v34 = vadd.f32 %v4085_v24, %v1161_v45  ;;  %v1649_v43 = vadd.f32 %v1648_v38, %v1320_v9 }
 0x289   :  { %v1491_v46 = vadd.f32 %v1490_v12, %v1162_v34  ;;  %v1782_v39 = vmax.f32 %v1649_v43, 0.0 }
 0x28b   :  { %v1719_v48 = vmax.f32 %v1491_v46, 0.0  ;;  %v1910_v50 = vpack.c.bf16 %v1782_v39, %v1782_v39 }
 0x28c   :  { %v1498_v41 = vpop.f32.mrf.mxu1  ;;  %v1321_v60 = vpop.f32.mrf.mxu2 }
 0x28d   :  { %v1499_v56 = vadd.f32 %v1498_v41, %v1170_v49  ;;  %v1847_v53 = vpack.c.bf16 %v1719_v48, %v1719_v48  ;;  %2039 = vst.msk [vmem:[#allocation2 + $0x1f0] sm:$0xf] %vm1914_vm3, %v1910_v50  ;;  %v1322_v57 = vadd.f32 %v4085_v24, %v1321_v60 }
 0x28e   :  { %v1164_v2 = vpop.f32.mrf.mxu0 }
 0x28f   :  { %v1722_v47 = vmax.f32 %v1499_v56, 0.0  ;;  %1976 = vst.msk [vmem:[#allocation2 + $0xf4] sm:$0xf] %vm1914_vm3, %v1847_v53  ;;  %v1165_v59 = vadd.f32 %v4085_v24, %v1164_v2  ;;  %v1651_v15 = vadd.f32 %v1650_v52, %v1322_v57 }
 0x291   :  { %v1850_v62 = vpack.c.bf16 %v1722_v47, %v1722_v47  ;;  %v1494_v51 = vadd.f32 %v1493_v28, %v1165_v59  ;;  %v1783_v55 = vmax.f32 %v1651_v15, 0.0 }
 0x293   :  { %1979 = vst.msk [vmem:[#allocation2 + $0x100] sm:$0xf] %vm1914_vm3, %v1850_v62  ;;  %v1720_v54 = vmax.f32 %v1494_v51, 0.0  ;;  %v1911_v4 = vpack.c.bf16 %v1783_v55, %v1783_v55 }
 0x294   :  { %v1500_v61 = vpop.f32.mrf.mxu1  ;;  %v1324_v6 = vpop.f32.mrf.mxu2 }
 0x295   :  { %v1501_v58 = vadd.f32 %v1500_v61, %v1172_v63  ;;  %v1848_v3 = vpack.c.bf16 %v1720_v54, %v1720_v54  ;;  %2040 = vst.msk [vmem:[#allocation2 + $0x1f4] sm:$0xf] %vm1914_vm3, %v1911_v4  ;;  %v1325_v10 = vadd.f32 %v4085_v24, %v1324_v6 }
 0x296   :  { %v1166_v14 = vpop.f32.mrf.mxu0 }
 0x297   :  { %v1723_v8 = vmax.f32 %v1501_v58, 0.0  ;;  %1977 = vst.msk [vmem:[#allocation2 + $0xf8] sm:$0xf] %vm1914_vm3, %v1848_v3  ;;  %v1167_v33 = vadd.f32 %v4085_v24, %v1166_v14  ;;  %v1654_v12 = vadd.f32 %v1653_v35, %v1325_v10 }
 0x299   :  { %v1851_v1 = vpack.c.bf16 %v1723_v8, %v1723_v8  ;;  %v1496_v44 = vadd.f32 %v1495_v42, %v1167_v33  ;;  %v1784_v18 = vmax.f32 %v1654_v12, 0.0 }
 0x29b   :  { %1980 = vst.msk [vmem:[#allocation2 + $0x104] sm:$0xf] %vm1914_vm3, %v1851_v1  ;;  %v1721_v5 = vmax.f32 %v1496_v44, 0.0  ;;  %v1912_v21 = vpack.c.bf16 %v1784_v18, %v1784_v18 }
 0x29c   :  { %v1326_v19 = vpop.f32.mrf.mxu2 }
 0x29d   :  { %v1849_v7 = vpack.c.bf16 %v1721_v5, %v1721_v5  ;;  %2041 = vst.msk [vmem:[#allocation2 + $0x1f8] sm:$0xf] %vm1914_vm3, %v1912_v21  ;;  %v1327_v0 = vadd.f32 %v4085_v24, %v1326_v19 }
 0x29f   :  { %1978 = vst.msk [vmem:[#allocation2 + $0xfc] sm:$0xf] %vm1914_vm3, %v1849_v7  ;;  %v1656_v23 = vadd.f32 %v1655_v13, %v1327_v0 }
 0x2a1   :  { %v1785_v11 = vmax.f32 %v1656_v23, 0.0 }
 0x2a3   :  { %v1913_v16 = vpack.c.bf16 %v1785_v11, %v1785_v11 }
 0x2a5   :  { %2042 = vst.msk [vmem:[#allocation2 + $0x1fc] sm:$0xf] %vm1914_vm3, %v1913_v16 }
 0x2a6   :  { %2055 = dma.vmem_to_hbm [thread:$0]  %s2048_s18, 8192, %s2050_s21, [#allocation3], %s2855_s22, %s2855_s22, %s2856_s23  }
 0x2a7   :  { %2851 = dma.done.wait [#allocation3], 8192  }
 0x2a8   :  { %2852 = vsyncadd [#allocation3], 4294959104 }
 0x2a9   :  { %2060 = vsyncpa [#allocation3], 1 }

</bundles_post_ra>
